<compile_context>
chip_gen: v7x
topology: tpu7x:2x2x1
jax: 0.10.0
libtpu: 0.0.40
codegen_flags: <defaults>
</compile_context>

<pallas_src>
import jax
import jax.numpy as jnp
from jax.experimental import pallas as pl
from jax.experimental.pallas import tpu as pltpu

STRUCTURE = {
    'input_layer': [280, 250],
    'hidden_1': [250, 250],
    'hidden_2': [250, 250],
    'hidden_3': [250, 250],
    'hidden_4': [250, 250],
    'hidden_5': [250, 250],
    'output_layer': [250, 60],
}
NUM_LAYERS = len(STRUCTURE)


def _round_up(n, m):
    return ((n + m - 1) // m) * m


def deep_noma_kernel(x_ref, *refs):
    """Fused MLP forward on one (TILE_B, features) batch tile.

    refs = (w0, b0, w1, b1, ..., w6, b6, out_ref).
    Weights are bf16 (padded to 128-lane multiples, ~0.9 MiB total) and sit
    resident in VMEM across all grid steps; the 7 MXU matmuls chain with no
    HBM round-trips between layers.  Bias-add / ReLU run in f32 on the VPU,
    activations are carried bf16 between layers.
    """
    out_ref = refs[-1]
    params = refs[:-1]
    n_layers = len(params) // 2

    h = x_ref[...].astype(jnp.bfloat16)
    acc = None
    for i in range(n_layers):
        w = params[2 * i][...]                 # bf16 (K_pad, N_pad)
        b = params[2 * i + 1][...]             # f32  (1, N_pad)
        acc = jnp.dot(h, w, preferred_element_type=jnp.float32) + b
        if 1 <= i < n_layers - 1:
            # hidden_1..hidden_5: ReLU (dropout is identity in eval mode)
            acc = jnp.maximum(acc, 0.0)
        # i == 0 (input_layer): Linear+BN only, no activation (matches forward)
        # i == n_layers-1 (output_layer): plain Linear, no activation
        if i < n_layers - 1:
            h = acc.astype(jnp.bfloat16)
    out_ref[...] = acc.astype(out_ref.dtype)


def init_params(key):
    """Deterministic parameter init mirroring the PyTorch module's __init__.

    Note: in the PyTorch code, kaiming init only hits the bare output Linear
    (the others are wrapped in nn.Sequential and keep default Linear init).
    Eval-mode BatchNorm1d (gamma=1, beta=0, running_mean=0, running_var=1) is
    folded into the Linear weight/bias as a scale of 1/sqrt(1 + eps).
    """
    eps = 1e-5
    bn_scale = 1.0 / jnp.sqrt(jnp.float32(1.0 + eps))
    params = []
    for name, (fan_in, fan_out) in STRUCTURE.items():
        key, kw, kb = jax.random.split(key, 3)
        if name == 'output_layer':
            w_bound = (6.0 / fan_in) ** 0.5        # kaiming_uniform, relu gain
        else:
            w_bound = (1.0 / fan_in) ** 0.5        # torch default Linear init
        b_bound = (1.0 / fan_in) ** 0.5
        W = jax.random.uniform(kw, (fan_in, fan_out), jnp.float32,
                               -w_bound, w_bound)
        b = jax.random.uniform(kb, (fan_out,), jnp.float32, -b_bound, b_bound)
        if name != 'output_layer':
            W = W * bn_scale
            b = b * bn_scale
        params.append((W, b))
    return params


def deep_noma_forward(x, params, tile_b=128):
    """Batch-tiled fused forward.  x: (B, 280) f32 -> (B, 60) f32."""
    batch, in_dim = x.shape
    out_dim = params[-1][0].shape[1]

    # ---- pad params to 128-lane multiples, store weights as bf16 -----------
    flat = []
    for W, b in params:
        k_pad = _round_up(W.shape[0], 128)
        n_pad = _round_up(W.shape[1], 128)
        Wp = jnp.pad(W, ((0, k_pad - W.shape[0]),
                         (0, n_pad - W.shape[1]))).astype(jnp.bfloat16)
        bp = jnp.pad(b, (0, n_pad - b.shape[0])).reshape(1, -1).astype(jnp.float32)
        flat.append(Wp)
        flat.append(bp)

    in_pad = _round_up(in_dim, 128)          # 280 -> 384
    out_pad = _round_up(out_dim, 128)        # 60  -> 128

    # ---- pad / tile the batch ----------------------------------------------
    tile_b = max(8, min(tile_b, _round_up(batch, 8)))
    b_pad = _round_up(batch, tile_b)
    xp = jnp.pad(x.astype(jnp.float32),
                 ((0, b_pad - batch), (0, in_pad - in_dim)))

    grid = (b_pad // tile_b,)

    in_specs = [pl.BlockSpec((tile_b, in_pad), lambda i: (i, 0))]
    for arr in flat:
        # Constant block index: fetched once, stays resident in VMEM.
        in_specs.append(pl.BlockSpec(arr.shape, lambda i: (0, 0)))
    out_specs = pl.BlockSpec((tile_b, out_pad), lambda i: (i, 0))

    flops = 2 * b_pad * sum(w.shape[0] * w.shape[1] for w in flat[0::2])
    bytes_accessed = int(xp.size * 4
                         + sum(a.size * a.dtype.itemsize for a in flat)
                         + b_pad * out_pad * 4)

    out_padded = pl.pallas_call(
        deep_noma_kernel,
        out_shape=jax.ShapeDtypeStruct((b_pad, out_pad), jnp.float32),
        grid=grid,
        in_specs=in_specs,
        out_specs=out_specs,
        compiler_params=pltpu.CompilerParams(
            dimension_semantics=("parallel",)),
        cost_estimate=pl.CostEstimate(flops=flops, transcendentals=0,
                                      bytes_accessed=bytes_accessed),
    )(xp, *flat)

    return out_padded[:batch, :out_dim]


def deep_noma_reference_bf16(x, params):
    """Pure-JAX reference with the same bf16-matmul / f32-accumulate recipe."""
    n = len(params)
    h = x.astype(jnp.bfloat16)
    for i, (W, b) in enumerate(params):
        acc = jnp.dot(h, W.astype(jnp.bfloat16),
                      preferred_element_type=jnp.float32) + b
        if 1 <= i < n - 1:
            acc = jnp.maximum(acc, 0.0)
        h = acc.astype(jnp.bfloat16)
    return acc


def deep_noma_reference_f32(x, params):
    """Full-precision reference (semantics check)."""
    h = x
    n = len(params)
    for i, (W, b) in enumerate(params):
        h = h @ W + b
        if 1 <= i < n - 1:
            h = jnp.maximum(h, 0.0)
    return h


if __name__ == "__main__":
    key = jax.random.PRNGKey(0)
    key, pkey, xkey = jax.random.split(key, 3)

    params = init_params(pkey)

    # Small deterministic input consistent with the module: (batch, 280).
    x = jax.random.normal(xkey, (8, 280), dtype=jnp.float32)

    out = deep_noma_forward(x, params)
    out = jax.block_until_ready(out)
    assert out.shape == (8, 60), out.shape

    ref_bf16 = deep_noma_reference_bf16(x, params)
    ref_f32 = deep_noma_reference_f32(x, params)
    assert jnp.allclose(out, ref_bf16, atol=2e-3, rtol=2e-3), \
        "mismatch vs bf16 reference"
    assert jnp.allclose(out, ref_f32, atol=5e-2, rtol=5e-2), \
        "mismatch vs f32 reference"

    # Exercise the batch grid / padding path (non-multiple-of-tile batch).
    key, xkey2 = jax.random.split(key)
    x2 = jax.random.normal(xkey2, (300, 280), dtype=jnp.float32)
    out2 = jax.block_until_ready(deep_noma_forward(x2, params, tile_b=128))
    assert out2.shape == (300, 60), out2.shape
    ref2 = deep_noma_reference_bf16(x2, params)
    assert jnp.allclose(out2, ref2, atol=2e-3, rtol=2e-3), \
        "mismatch vs bf16 reference (tiled batch)"

    print("KERNEL_OK")
</pallas_src>

<mosaic_0001>
module attributes {stable_mosaic.version = 11 : i64} {
  func.func @deep_noma_kernel(%arg0: i32, %arg1: memref<8x384xf32, #tpu.memory_space<vmem>>, %arg2: memref<384x256xbf16, #tpu.memory_space<vmem>>, %arg3: memref<1x256xf32, #tpu.memory_space<vmem>>, %arg4: memref<256x256xbf16, #tpu.memory_space<vmem>>, %arg5: memref<1x256xf32, #tpu.memory_space<vmem>>, %arg6: memref<256x256xbf16, #tpu.memory_space<vmem>>, %arg7: memref<1x256xf32, #tpu.memory_space<vmem>>, %arg8: memref<256x256xbf16, #tpu.memory_space<vmem>>, %arg9: memref<1x256xf32, #tpu.memory_space<vmem>>, %arg10: memref<256x256xbf16, #tpu.memory_space<vmem>>, %arg11: memref<1x256xf32, #tpu.memory_space<vmem>>, %arg12: memref<256x256xbf16, #tpu.memory_space<vmem>>, %arg13: memref<1x256xf32, #tpu.memory_space<vmem>>, %arg14: memref<256x128xbf16, #tpu.memory_space<vmem>>, %arg15: memref<1x128xf32, #tpu.memory_space<vmem>>, %arg16: memref<8x128xf32, #tpu.memory_space<vmem>>) attributes {dimension_semantics = [#tpu.dimension_semantics<parallel>], iteration_bounds = array<i64: 1>, scalar_prefetch = 0 : i64, scratch_operands = 0 : i64, tpu.core_type = #tpu.core_type<tc>, window_params = [{transform_indices = @transform_0, window_bounds = array<i64: 8, 384>}, {pipeline_mode = #tpu.pipeline_mode<synchronous>, transform_indices = @transform_1, window_bounds = array<i64: 384, 256>}, {pipeline_mode = #tpu.pipeline_mode<synchronous>, transform_indices = @transform_2, window_bounds = array<i64: 1, 256>}, {pipeline_mode = #tpu.pipeline_mode<synchronous>, transform_indices = @transform_3, window_bounds = array<i64: 256, 256>}, {pipeline_mode = #tpu.pipeline_mode<synchronous>, transform_indices = @transform_4, window_bounds = array<i64: 1, 256>}, {pipeline_mode = #tpu.pipeline_mode<synchronous>, transform_indices = @transform_5, window_bounds = array<i64: 256, 256>}, {pipeline_mode = #tpu.pipeline_mode<synchronous>, transform_indices = @transform_6, window_bounds = array<i64: 1, 256>}, {pipeline_mode = #tpu.pipeline_mode<synchronous>, transform_indices = @transform_7, window_bounds = array<i64: 256, 256>}, {pipeline_mode = #tpu.pipeline_mode<synchronous>, transform_indices = @transform_8, window_bounds = array<i64: 1, 256>}, {pipeline_mode = #tpu.pipeline_mode<synchronous>, transform_indices = @transform_9, window_bounds = array<i64: 256, 256>}, {pipeline_mode = #tpu.pipeline_mode<synchronous>, transform_indices = @transform_10, window_bounds = array<i64: 1, 256>}, {pipeline_mode = #tpu.pipeline_mode<synchronous>, transform_indices = @transform_11, window_bounds = array<i64: 256, 256>}, {pipeline_mode = #tpu.pipeline_mode<synchronous>, transform_indices = @transform_12, window_bounds = array<i64: 1, 256>}, {pipeline_mode = #tpu.pipeline_mode<synchronous>, transform_indices = @transform_13, window_bounds = array<i64: 256, 128>}, {pipeline_mode = #tpu.pipeline_mode<synchronous>, transform_indices = @transform_14, window_bounds = array<i64: 1, 128>}, {transform_indices = @transform_15, window_bounds = array<i64: 8, 128>}]} {
    %c0 = arith.constant 0 : index
    %c0_0 = arith.constant 0 : index
    %0 = vector.load %arg1[%c0, %c0_0] : memref<8x384xf32, #tpu.memory_space<vmem>>, vector<8x384xf32>
    %1 = arith.truncf %0 : vector<8x384xf32> to vector<8x384xbf16>
    %c0_1 = arith.constant 0 : index
    %c0_2 = arith.constant 0 : index
    %2 = vector.load %arg2[%c0_1, %c0_2] : memref<384x256xbf16, #tpu.memory_space<vmem>>, vector<384x256xbf16>
    %c0_3 = arith.constant 0 : index
    %c0_4 = arith.constant 0 : index
    %3 = vector.load %arg3[%c0_3, %c0_4] : memref<1x256xf32, #tpu.memory_space<vmem>>, vector<1x256xf32>
    %cst = arith.constant dense<0.000000e+00> : vector<8x256xf32>
    %4 = tpu.matmul %1, %2, %cst {dimension_numbers = #tpu.dot_dimension_numbers<[1], [0], [0], [1], [0, 0, 1, 1], [], []>} : vector<8x384xbf16>, vector<384x256xbf16>, vector<8x256xf32> -> vector<8x256xf32>
    %5 = vector.broadcast %3 : vector<1x256xf32> to vector<8x256xf32>
    %6 = arith.addf %4, %5 : vector<8x256xf32>
    %7 = arith.truncf %6 : vector<8x256xf32> to vector<8x256xbf16>
    %c0_5 = arith.constant 0 : index
    %c0_6 = arith.constant 0 : index
    %8 = vector.load %arg4[%c0_5, %c0_6] : memref<256x256xbf16, #tpu.memory_space<vmem>>, vector<256x256xbf16>
    %c0_7 = arith.constant 0 : index
    %c0_8 = arith.constant 0 : index
    %9 = vector.load %arg5[%c0_7, %c0_8] : memref<1x256xf32, #tpu.memory_space<vmem>>, vector<1x256xf32>
    %cst_9 = arith.constant dense<0.000000e+00> : vector<8x256xf32>
    %10 = tpu.matmul %7, %8, %cst_9 {dimension_numbers = #tpu.dot_dimension_numbers<[1], [0], [0], [1], [0, 0, 1, 1], [], []>} : vector<8x256xbf16>, vector<256x256xbf16>, vector<8x256xf32> -> vector<8x256xf32>
    %11 = vector.broadcast %9 : vector<1x256xf32> to vector<8x256xf32>
    %12 = arith.addf %10, %11 : vector<8x256xf32>
    %cst_10 = arith.constant 0.000000e+00 : f32
    %13 = vector.broadcast %cst_10 : f32 to vector<8x256xf32>
    %14 = arith.maximumf %12, %13 : vector<8x256xf32>
    %15 = arith.truncf %14 : vector<8x256xf32> to vector<8x256xbf16>
    %c0_11 = arith.constant 0 : index
    %c0_12 = arith.constant 0 : index
    %16 = vector.load %arg6[%c0_11, %c0_12] : memref<256x256xbf16, #tpu.memory_space<vmem>>, vector<256x256xbf16>
    %c0_13 = arith.constant 0 : index
    %c0_14 = arith.constant 0 : index
    %17 = vector.load %arg7[%c0_13, %c0_14] : memref<1x256xf32, #tpu.memory_space<vmem>>, vector<1x256xf32>
    %cst_15 = arith.constant dense<0.000000e+00> : vector<8x256xf32>
    %18 = tpu.matmul %15, %16, %cst_15 {dimension_numbers = #tpu.dot_dimension_numbers<[1], [0], [0], [1], [0, 0, 1, 1], [], []>} : vector<8x256xbf16>, vector<256x256xbf16>, vector<8x256xf32> -> vector<8x256xf32>
    %19 = vector.broadcast %17 : vector<1x256xf32> to vector<8x256xf32>
    %20 = arith.addf %18, %19 : vector<8x256xf32>
    %cst_16 = arith.constant 0.000000e+00 : f32
    %21 = vector.broadcast %cst_16 : f32 to vector<8x256xf32>
    %22 = arith.maximumf %20, %21 : vector<8x256xf32>
    %23 = arith.truncf %22 : vector<8x256xf32> to vector<8x256xbf16>
    %c0_17 = arith.constant 0 : index
    %c0_18 = arith.constant 0 : index
    %24 = vector.load %arg8[%c0_17, %c0_18] : memref<256x256xbf16, #tpu.memory_space<vmem>>, vector<256x256xbf16>
    %c0_19 = arith.constant 0 : index
    %c0_20 = arith.constant 0 : index
    %25 = vector.load %arg9[%c0_19, %c0_20] : memref<1x256xf32, #tpu.memory_space<vmem>>, vector<1x256xf32>
    %cst_21 = arith.constant dense<0.000000e+00> : vector<8x256xf32>
    %26 = tpu.matmul %23, %24, %cst_21 {dimension_numbers = #tpu.dot_dimension_numbers<[1], [0], [0], [1], [0, 0, 1, 1], [], []>} : vector<8x256xbf16>, vector<256x256xbf16>, vector<8x256xf32> -> vector<8x256xf32>
    %27 = vector.broadcast %25 : vector<1x256xf32> to vector<8x256xf32>
    %28 = arith.addf %26, %27 : vector<8x256xf32>
    %cst_22 = arith.constant 0.000000e+00 : f32
    %29 = vector.broadcast %cst_22 : f32 to vector<8x256xf32>
    %30 = arith.maximumf %28, %29 : vector<8x256xf32>
    %31 = arith.truncf %30 : vector<8x256xf32> to vector<8x256xbf16>
    %c0_23 = arith.constant 0 : index
    %c0_24 = arith.constant 0 : index
    %32 = vector.load %arg10[%c0_23, %c0_24] : memref<256x256xbf16, #tpu.memory_space<vmem>>, vector<256x256xbf16>
    %c0_25 = arith.constant 0 : index
    %c0_26 = arith.constant 0 : index
    %33 = vector.load %arg11[%c0_25, %c0_26] : memref<1x256xf32, #tpu.memory_space<vmem>>, vector<1x256xf32>
    %cst_27 = arith.constant dense<0.000000e+00> : vector<8x256xf32>
    %34 = tpu.matmul %31, %32, %cst_27 {dimension_numbers = #tpu.dot_dimension_numbers<[1], [0], [0], [1], [0, 0, 1, 1], [], []>} : vector<8x256xbf16>, vector<256x256xbf16>, vector<8x256xf32> -> vector<8x256xf32>
    %35 = vector.broadcast %33 : vector<1x256xf32> to vector<8x256xf32>
    %36 = arith.addf %34, %35 : vector<8x256xf32>
    %cst_28 = arith.constant 0.000000e+00 : f32
    %37 = vector.broadcast %cst_28 : f32 to vector<8x256xf32>
    %38 = arith.maximumf %36, %37 : vector<8x256xf32>
    %39 = arith.truncf %38 : vector<8x256xf32> to vector<8x256xbf16>
    %c0_29 = arith.constant 0 : index
    %c0_30 = arith.constant 0 : index
    %40 = vector.load %arg12[%c0_29, %c0_30] : memref<256x256xbf16, #tpu.memory_space<vmem>>, vector<256x256xbf16>
    %c0_31 = arith.constant 0 : index
    %c0_32 = arith.constant 0 : index
    %41 = vector.load %arg13[%c0_31, %c0_32] : memref<1x256xf32, #tpu.memory_space<vmem>>, vector<1x256xf32>
    %cst_33 = arith.constant dense<0.000000e+00> : vector<8x256xf32>
    %42 = tpu.matmul %39, %40, %cst_33 {dimension_numbers = #tpu.dot_dimension_numbers<[1], [0], [0], [1], [0, 0, 1, 1], [], []>} : vector<8x256xbf16>, vector<256x256xbf16>, vector<8x256xf32> -> vector<8x256xf32>
    %43 = vector.broadcast %41 : vector<1x256xf32> to vector<8x256xf32>
    %44 = arith.addf %42, %43 : vector<8x256xf32>
    %cst_34 = arith.constant 0.000000e+00 : f32
    %45 = vector.broadcast %cst_34 : f32 to vector<8x256xf32>
    %46 = arith.maximumf %44, %45 : vector<8x256xf32>
    %47 = arith.truncf %46 : vector<8x256xf32> to vector<8x256xbf16>
    %c0_35 = arith.constant 0 : index
    %c0_36 = arith.constant 0 : index
    %48 = vector.load %arg14[%c0_35, %c0_36] : memref<256x128xbf16, #tpu.memory_space<vmem>>, vector<256x128xbf16>
    %c0_37 = arith.constant 0 : index
    %c0_38 = arith.constant 0 : index
    %49 = vector.load %arg15[%c0_37, %c0_38] : memref<1x128xf32, #tpu.memory_space<vmem>>, vector<1x128xf32>
    %cst_39 = arith.constant dense<0.000000e+00> : vector<8x128xf32>
    %50 = tpu.matmul %47, %48, %cst_39 {dimension_numbers = #tpu.dot_dimension_numbers<[1], [0], [0], [1], [0, 0, 1, 1], [], []>} : vector<8x256xbf16>, vector<256x128xbf16>, vector<8x128xf32> -> vector<8x128xf32>
    %51 = vector.broadcast %49 : vector<1x128xf32> to vector<8x128xf32>
    %52 = arith.addf %50, %51 : vector<8x128xf32>
    %c0_40 = arith.constant 0 : index
    %c0_41 = arith.constant 0 : index
    %53 = vector.load %arg16[%c0_40, %c0_41] : memref<8x128xf32, #tpu.memory_space<vmem>>, vector<8x128xf32>
    tpu.vector_store %arg16[%c0_40, %c0_41], %52 {strides = array<i32>} : memref<8x128xf32, #tpu.memory_space<vmem>>, vector<8x128xf32>,
    return
  }
  func.func @transform_0(%arg0: i32) -> (i32, i32) {
    %c0_i32 = arith.constant 0 : i32
    %c0_i32_0 = arith.constant 0 : i32
    return %arg0, %c0_i32 : i32, i32
  }
  func.func @transform_1(%arg0: i32) -> (i32, i32) {
    %c0_i32 = arith.constant 0 : i32
    %c0_i32_0 = arith.constant 0 : i32
    %c0_i32_1 = arith.constant 0 : i32
    return %c0_i32, %c0_i32_0 : i32, i32
  }
  func.func @transform_2(%arg0: i32) -> (i32, i32) {
    %c0_i32 = arith.constant 0 : i32
    %c0_i32_0 = arith.constant 0 : i32
    %c0_i32_1 = arith.constant 0 : i32
    return %c0_i32, %c0_i32_0 : i32, i32
  }
  func.func @transform_3(%arg0: i32) -> (i32, i32) {
    %c0_i32 = arith.constant 0 : i32
    %c0_i32_0 = arith.constant 0 : i32
    %c0_i32_1 = arith.constant 0 : i32
    return %c0_i32, %c0_i32_0 : i32, i32
  }
  func.func @transform_4(%arg0: i32) -> (i32, i32) {
    %c0_i32 = arith.constant 0 : i32
    %c0_i32_0 = arith.constant 0 : i32
    %c0_i32_1 = arith.constant 0 : i32
    return %c0_i32, %c0_i32_0 : i32, i32
  }
  func.func @transform_5(%arg0: i32) -> (i32, i32) {
    %c0_i32 = arith.constant 0 : i32
    %c0_i32_0 = arith.constant 0 : i32
    %c0_i32_1 = arith.constant 0 : i32
    return %c0_i32, %c0_i32_0 : i32, i32
  }
  func.func @transform_6(%arg0: i32) -> (i32, i32) {
    %c0_i32 = arith.constant 0 : i32
    %c0_i32_0 = arith.constant 0 : i32
    %c0_i32_1 = arith.constant 0 : i32
    return %c0_i32, %c0_i32_0 : i32, i32
  }
  func.func @transform_7(%arg0: i32) -> (i32, i32) {
    %c0_i32 = arith.constant 0 : i32
    %c0_i32_0 = arith.constant 0 : i32
    %c0_i32_1 = arith.constant 0 : i32
    return %c0_i32, %c0_i32_0 : i32, i32
  }
  func.func @transform_8(%arg0: i32) -> (i32, i32) {
    %c0_i32 = arith.constant 0 : i32
    %c0_i32_0 = arith.constant 0 : i32
    %c0_i32_1 = arith.constant 0 : i32
    return %c0_i32, %c0_i32_0 : i32, i32
  }
  func.func @transform_9(%arg0: i32) -> (i32, i32) {
    %c0_i32 = arith.constant 0 : i32
    %c0_i32_0 = arith.constant 0 : i32
    %c0_i32_1 = arith.constant 0 : i32
    return %c0_i32, %c0_i32_0 : i32, i32
  }
  func.func @transform_10(%arg0: i32) -> (i32, i32) {
    %c0_i32 = arith.constant 0 : i32
    %c0_i32_0 = arith.constant 0 : i32
    %c0_i32_1 = arith.constant 0 : i32
    return %c0_i32, %c0_i32_0 : i32, i32
  }
  func.func @transform_11(%arg0: i32) -> (i32, i32) {
    %c0_i32 = arith.constant 0 : i32
    %c0_i32_0 = arith.constant 0 : i32
    %c0_i32_1 = arith.constant 0 : i32
    return %c0_i32, %c0_i32_0 : i32, i32
  }
  func.func @transform_12(%arg0: i32) -> (i32, i32) {
    %c0_i32 = arith.constant 0 : i32
    %c0_i32_0 = arith.constant 0 : i32
    %c0_i32_1 = arith.constant 0 : i32
    return %c0_i32, %c0_i32_0 : i32, i32
  }
  func.func @transform_13(%arg0: i32) -> (i32, i32) {
    %c0_i32 = arith.constant 0 : i32
    %c0_i32_0 = arith.constant 0 : i32
    %c0_i32_1 = arith.constant 0 : i32
    return %c0_i32, %c0_i32_0 : i32, i32
  }
  func.func @transform_14(%arg0: i32) -> (i32, i32) {
    %c0_i32 = arith.constant 0 : i32
    %c0_i32_0 = arith.constant 0 : i32
    %c0_i32_1 = arith.constant 0 : i32
    return %c0_i32, %c0_i32_0 : i32, i32
  }
  func.func @transform_15(%arg0: i32) -> (i32, i32) {
    %c0_i32 = arith.constant 0 : i32
    %c0_i32_0 = arith.constant 0 : i32
    return %arg0, %c0_i32 : i32, i32
  }
}

</mosaic_0001>

<bundles_post_ra>
// kernel: tpu_custom_call.1
= control target key start
LH: loop header
LB: loop body
LE: loop exit
PB: predicated region body
PF: predicated region fallthrough
CT: control target
= control target key end

     0   :  { %s3051_s0 = inlined_call_operand.hbm [shape: f32[8,384], index: 0, kind: input, shape index: {}]   ;;  %s3052_s1 = inlined_call_operand.hbm [shape: bf16[384,256], index: 1, kind: input, shape index: {}]   ;;  %s3053_s2 = inlined_call_operand.vmem [shape: f32[1,256], index: 2, kind: input, shape index: {}]   ;;  %s3054_s3 = inlined_call_operand.hbm [shape: bf16[256,256], index: 3, kind: input, shape index: {}]   ;;  %s3055_s4 = inlined_call_operand.vmem [shape: f32[1,256], index: 4, kind: input, shape index: {}]   ;;  %s3056_s5 = inlined_call_operand.hbm [shape: bf16[256,256], index: 5, kind: input, shape index: {}]   ;;  %s3057_s6 = inlined_call_operand.vmem [shape: f32[1,256], index: 6, kind: input, shape index: {}]   ;;  %s3058_s7 = inlined_call_operand.hbm [shape: bf16[256,256], index: 7, kind: input, shape index: {}]   ;;  %s3059_s8 = inlined_call_operand.vmem [shape: f32[1,256], index: 8, kind: input, shape index: {}]   ;;  %s3060_s9 = inlined_call_operand.hbm [shape: bf16[256,256], index: 9, kind: input, shape index: {}]   ;;  %s3061_s10 = inlined_call_operand.vmem [shape: f32[1,256], index: 10, kind: input, shape index: {}]   ;;  %s3062_s11 = inlined_call_operand.hbm [shape: bf16[256,256], index: 11, kind: input, shape index: {}]   ;;  %s3063_s12 = inlined_call_operand.vmem [shape: f32[1,256], index: 12, kind: input, shape index: {}]   ;;  %s3064_s13 = inlined_call_operand.hbm [shape: bf16[256,128], index: 13, kind: input, shape index: {}]   ;;  %s3065_s14 = inlined_call_operand.vmem [shape: f32[1,128], index: 14, kind: input, shape index: {}]   ;;  %s3066_s15 = inlined_call_operand.hbm [shape: f32[8,128], index: 15, kind: output, shape index: {}]  }
   0x1   :  { %3068 = sst [smem:[#allocation23_spill]] %s3066_s15 }
   0x2   :  { %20 = vsyncpa [#allocation3], 0 }
   0x3   :  { %21 = vsyncpa [#allocation6], 0 }
   0x4   :  { %22 = vsyncpa [#allocation9], 0 }
   0x5   :  { %23 = vsyncpa [#allocation12], 0 }
   0x6   :  { %24 = vsyncpa [#allocation15], 0 }
   0x7   :  { %25 = vsyncpa [#allocation4], 0  ;;  %s2794_s18 = smov [#allocation5]   ;;  %s2584_s22 = scalar_lea.hbm %s3052_s1, 6144 }
   0x8   :  { %s41_s19 = sshll.u32 %s2794_s18, 4  ;;  %p2585_p0 = scmp.ne.s32.totalorder %s3052_s1, %s2584_s22  ;;  %s42_s19 = int_to_ptr.vmem [resolvable:$true] %s41_s19 }
   0x9   :  { %p2588_p1 = scmp.lt.u32.totalorder %s2584_s22, %s3052_s1 }
   0xb   :  { %p2590_p2 = pnand %p2588_p1, %p2585_p0 }
   0xd   :  { %2593 = shalt.err (!%p2590_p2)
}
   0xe   :  { %s2594_s27 = scalar_lea.vmem %s42_s19, 6144  ;;  %p2599_p4 = scmp.lt.s32.totalorder %s42_s19, %s42_s19 }
   0xf   :  { %p2595_p3 = scmp.ne.s32.totalorder %s42_s19, %s2594_s27  ;;  %p2600_p5 = scmp.lt.s32.totalorder %s2594_s27, %s2594_s27 }
  0x11   :  { %p2601_p6 = por %p2600_p5, %p2599_p4 }
  0x13   :  { %p2602_p7 = pnand %p2601_p6, %p2595_p3 }
  0x15   :  { %2605 = shalt.err (!%p2602_p7)
}
  0x16   :  { %s2795_s28 = smov 128   ;;  %s2796_s29 = smov 8  }
  0x17   :  { %47 = dma.hbm_to_vmem [thread:$0]  %s3052_s1, 6144, %s42_s19, [#allocation6], %s2795_s28, %s2795_s28, %s2796_s29  }
  0x18   :  { %s2797_s17 = smov [#allocation8]   ;;  %s2798_s20 = smov [#allocation11]  }
  0x19   :  { %s69_s18 = sshll.u32 %s2797_s17, 4  ;;  %s97_s21 = sshll.u32 %s2798_s20, 4  ;;  %s70_s18 = int_to_ptr.vmem [resolvable:$true] %s69_s18  ;;  %s98_s21 = int_to_ptr.vmem [resolvable:$true] %s97_s21 }
  0x1a   :  { %s2606_s24 = scalar_lea.hbm %s3056_s5, 4096 }
  0x1b   :  { %p2607_p8 = scmp.ne.s32.totalorder %s3056_s5, %s2606_s24  ;;  %p2610_p9 = scmp.lt.u32.totalorder %s2606_s24, %s3056_s5 }
  0x1d   :  { %p2612_p10 = pnand %p2610_p9, %p2607_p8 }
  0x1f   :  { %2615 = shalt.err (!%p2612_p10)
}
  0x20   :  { %s2616_s1 = scalar_lea.vmem %s70_s18, 4096  ;;  %p2621_p12 = scmp.lt.s32.totalorder %s70_s18, %s70_s18 }
  0x21   :  { %p2617_p11 = scmp.ne.s32.totalorder %s70_s18, %s2616_s1  ;;  %p2622_p13 = scmp.lt.s32.totalorder %s2616_s1, %s2616_s1 }
  0x23   :  { %p2623_p0 = por %p2622_p13, %p2621_p12 }
  0x25   :  { %p2624_p1 = pnand %p2623_p0, %p2617_p11 }
  0x27   :  { %2627 = shalt.err (!%p2624_p1)
}
  0x28   :  { %75 = dma.hbm_to_vmem [thread:$0]  %s3056_s5, 4096, %s70_s18, [#allocation9], %s2795_s28, %s2795_s28, %s2796_s29  }
  0x29   :  { %s2628_s17 = scalar_lea.hbm %s3060_s9, 4096 }
  0x2a   :  { %p2629_p2 = scmp.ne.s32.totalorder %s3060_s9, %s2628_s17  ;;  %p2632_p3 = scmp.lt.u32.totalorder %s2628_s17, %s3060_s9 }
  0x2c   :  { %p2634_p4 = pnand %p2632_p3, %p2629_p2 }
  0x2e   :  { %2637 = shalt.err (!%p2634_p4)
}
  0x2f   :  { %s2638_s25 = scalar_lea.vmem %s98_s21, 4096  ;;  %p2643_p6 = scmp.lt.s32.totalorder %s98_s21, %s98_s21 }
  0x30   :  { %p2639_p5 = scmp.ne.s32.totalorder %s98_s21, %s2638_s25  ;;  %p2644_p7 = scmp.lt.s32.totalorder %s2638_s25, %s2638_s25 }
  0x32   :  { %p2645_p8 = por %p2644_p7, %p2643_p6 }
  0x34   :  { %p2646_p9 = pnand %p2645_p8, %p2639_p5 }
  0x36   :  { %2649 = shalt.err (!%p2646_p9)
}
  0x37   :  { %103 = dma.hbm_to_vmem [thread:$0]  %s3060_s9, 4096, %s98_s21, [#allocation12], %s2795_s28, %s2795_s28, %s2796_s29  }
  0x38   :  { %s2799_s26 = smov [#allocation2]   ;;  %s2800_s1 = smov [#allocation7]  }
  0x39   :  { %s32_s27 = sshll.u32 %s2799_s26, 4  ;;  %s55_s19 = sshll.u32 %s2800_s1, 4  ;;  %s33_s27 = int_to_ptr.vmem [resolvable:$true] %s32_s27  ;;  %s56_s19 = int_to_ptr.vmem [resolvable:$true] %s55_s19 }
  0x3a   :  { %s2650_s15 = scalar_lea.hbm %s3051_s0, 384 }
  0x3b   :  { %p2651_p10 = scmp.ne.s32.totalorder %s3051_s0, %s2650_s15  ;;  %p2654_p11 = scmp.lt.u32.totalorder %s2650_s15, %s3051_s0 }
  0x3d   :  { %p2656_p12 = pnand %p2654_p11, %p2651_p10 }
  0x3f   :  { %2659 = shalt.err (!%p2656_p12)
}
  0x40   :  { %s2660_s9 = scalar_lea.vmem %s33_s27, 384  ;;  %p2665_p0 = scmp.lt.s32.totalorder %s33_s27, %s33_s27 }
  0x41   :  { %p2661_p13 = scmp.ne.s32.totalorder %s33_s27, %s2660_s9  ;;  %p2666_p1 = scmp.lt.s32.totalorder %s2660_s9, %s2660_s9 }
  0x43   :  { %p2667_p2 = por %p2666_p1, %p2665_p0 }
  0x45   :  { %p2668_p3 = pnand %p2667_p2, %p2661_p13 }
  0x47   :  { %2671 = shalt.err (!%p2668_p3)
}
  0x48   :  { %35 = dma.hbm_to_vmem [thread:$0]  %s3051_s0, 384, %s33_s27, [#allocation3]  }
  0x49   :  { %s2672_s18 = scalar_lea.hbm %s3054_s3, 4096 }
  0x4a   :  { %p2673_p4 = scmp.ne.s32.totalorder %s3054_s3, %s2672_s18  ;;  %p2676_p5 = scmp.lt.u32.totalorder %s2672_s18, %s3054_s3 }
  0x4c   :  { %p2678_p6 = pnand %p2676_p5, %p2673_p4 }
  0x4e   :  { %2681 = shalt.err (!%p2678_p6)
}
  0x4f   :  { %s2682_s15 = scalar_lea.vmem %s56_s19, 4096  ;;  %p2687_p8 = scmp.lt.s32.totalorder %s56_s19, %s56_s19 }
  0x50   :  { %p2683_p7 = scmp.ne.s32.totalorder %s56_s19, %s2682_s15  ;;  %p2688_p9 = scmp.lt.s32.totalorder %s2682_s15, %s2682_s15 }
  0x52   :  { %p2689_p10 = por %p2688_p9, %p2687_p8 }
  0x54   :  { %p2690_p11 = pnand %p2689_p10, %p2683_p7 }
  0x56   :  { %2693 = shalt.err (!%p2690_p11)
}
  0x57   :  { %61 = dma.hbm_to_vmem [thread:$0]  %s3054_s3, 4096, %s56_s19, [#allocation6], %s2795_s28, %s2795_s28, %s2796_s29  }
  0x58   :  { %s2801_s17 = smov [#allocation10]   ;;  %s2802_s22 = smov [#allocation13]  }
  0x59   :  { %s83_s20 = sshll.u32 %s2801_s17, 4  ;;  %s111_s23 = sshll.u32 %s2802_s22, 4  ;;  %s84_s20 = int_to_ptr.vmem [resolvable:$true] %s83_s20  ;;  %s112_s23 = int_to_ptr.vmem [resolvable:$true] %s111_s23 }
  0x5a   :  { %s2694_s24 = scalar_lea.hbm %s3058_s7, 4096 }
  0x5b   :  { %p2695_p12 = scmp.ne.s32.totalorder %s3058_s7, %s2694_s24  ;;  %p2698_p13 = scmp.lt.u32.totalorder %s2694_s24, %s3058_s7 }
  0x5d   :  { %p2700_p0 = pnand %p2698_p13, %p2695_p12 }
  0x5f   :  { %2703 = shalt.err (!%p2700_p0)
}
  0x60   :  { %s2704_s3 = scalar_lea.vmem %s84_s20, 4096  ;;  %p2709_p2 = scmp.lt.s32.totalorder %s84_s20, %s84_s20 }
  0x61   :  { %p2705_p1 = scmp.ne.s32.totalorder %s84_s20, %s2704_s3  ;;  %p2710_p3 = scmp.lt.s32.totalorder %s2704_s3, %s2704_s3 }
  0x63   :  { %p2711_p4 = por %p2710_p3, %p2709_p2 }
  0x65   :  { %p2712_p5 = pnand %p2711_p4, %p2705_p1 }
  0x67   :  { %2715 = shalt.err (!%p2712_p5)
}
  0x68   :  { %89 = dma.hbm_to_vmem [thread:$0]  %s3058_s7, 4096, %s84_s20, [#allocation9], %s2795_s28, %s2795_s28, %s2796_s29  }
  0x69   :  { %s2716_s15 = scalar_lea.hbm %s3062_s11, 4096 }
  0x6a   :  { %p2717_p6 = scmp.ne.s32.totalorder %s3062_s11, %s2716_s15  ;;  %p2720_p7 = scmp.lt.u32.totalorder %s2716_s15, %s3062_s11 }
  0x6c   :  { %p2722_p8 = pnand %p2720_p7, %p2717_p6 }
  0x6e   :  { %2725 = shalt.err (!%p2722_p8)
}
  0x6f   :  { %s2726_s9 = scalar_lea.vmem %s112_s23, 4096  ;;  %p2731_p10 = scmp.lt.s32.totalorder %s112_s23, %s112_s23 }
  0x70   :  { %p2727_p9 = scmp.ne.s32.totalorder %s112_s23, %s2726_s9  ;;  %p2732_p11 = scmp.lt.s32.totalorder %s2726_s9, %s2726_s9 }
  0x72   :  { %p2733_p12 = por %p2732_p11, %p2731_p10 }
  0x74   :  { %p2734_p13 = pnand %p2733_p12, %p2727_p9 }
  0x76   :  { %2737 = shalt.err (!%p2734_p13)
}
  0x77   :  { %117 = dma.hbm_to_vmem [thread:$0]  %s3062_s11, 4096, %s112_s23, [#allocation12], %s2795_s28, %s2795_s28, %s2796_s29  }
  0x78   :  { %s2803_s21 = smov [#allocation14]   ;;  %s2738_s18 = scalar_lea.hbm %s3064_s13, 2048 }
  0x79   :  { %s125_s24 = sshll.u32 %s2803_s21, 4  ;;  %p2739_p0 = scmp.ne.s32.totalorder %s3064_s13, %s2738_s18  ;;  %s126_s24 = int_to_ptr.vmem [resolvable:$true] %s125_s24 }
  0x7a   :  { %p2742_p1 = scmp.lt.u32.totalorder %s2738_s18, %s3064_s13 }
  0x7c   :  { %p2744_p2 = pnand %p2742_p1, %p2739_p0 }
  0x7e   :  { %2747 = shalt.err (!%p2744_p2)
}
  0x7f   :  { %s2748_s30 = scalar_lea.vmem %s126_s24, 2048  ;;  %p2753_p4 = scmp.lt.s32.totalorder %s126_s24, %s126_s24 }
  0x80   :  { %p2749_p3 = scmp.ne.s32.totalorder %s126_s24, %s2748_s30  ;;  %p2754_p5 = scmp.lt.s32.totalorder %s2748_s30, %s2748_s30 }
  0x82   :  { %p2755_p6 = por %p2754_p5, %p2753_p4 }
  0x84   :  { %p2756_p7 = pnand %p2755_p6, %p2749_p3 }
  0x86   :  { %2759 = shalt.err (!%p2756_p7)
}
  0x87   :  { %s2804_s11 = smov 64   ;;  %s2805_s28 = smov 4  }
  0x88   :  { %131 = dma.hbm_to_vmem [thread:$0]  %s3064_s13, 2048, %s126_s24, [#allocation15], %s2804_s11, %s2804_s11, %s2805_s28  }
  0x89   :  { %2782 = dma.done.wait [#allocation3], 384  }
  0x8a   :  { %2783 = vsyncadd [#allocation3], 4294966912 }
  0x8b   :  { %2784 = dma.done.wait [#allocation6], 10240  }
  0x8c   :  { %2785 = vsyncadd [#allocation6], 4294957056 }
  0x8d   :  { %2786 = dma.done.wait [#allocation9], 8192  }
  0x8e   :  { %2787 = vsyncadd [#allocation9], 4294959104 }
  0x8f   :  { %2788 = dma.done.wait [#allocation12], 8192  }
  0x90   :  { %2789 = vsyncadd [#allocation12], 4294959104 }
  0x91   :  { %2790 = dma.done.wait [#allocation15], 2048  }
  0x92   :  { %2791 = vsyncadd [#allocation15], 4294965248  ;;  %v2256_v0 = vld [vmem:[#allocation5 + $0x4] ss:$8 sps:$4 sm:$0xff]   ;;  %v2258_v1 = vld [vmem:[#allocation5] ss:$8 sps:$4 sm:$0xff]  }
  0x93   :  { %465 = vmatprep.subr.bf16.mxu0 %v2256_v0  ;;  %v2259_v2 = vld [vmem:[#allocation5 + $0x14] ss:$8 sps:$4 sm:$0xff]   ;;  %v2261_v3 = vld [vmem:[#allocation5 + $0x10] ss:$8 sps:$4 sm:$0xff]   ;;  %v2262_v4 = vld [vmem:[#allocation5 + $0x24] ss:$8 sps:$4 sm:$0xff]  }
  0x94   :  { %466 = vmatpush1.bf16.msra.mxu0 %v2258_v1  ;;  %v2264_v5 = vld [vmem:[#allocation5 + $0x20] ss:$8 sps:$4 sm:$0xff]   ;;  %v2265_v6 = vld [vmem:[#allocation5 + $0x34] ss:$8 sps:$4 sm:$0xff]   ;;  %v2267_v7 = vld [vmem:[#allocation5 + $0x30] ss:$8 sps:$4 sm:$0xff]  }
  0x95   :  { %467 = vmatprep.subr.bf16.mxu0 %v2259_v2  ;;  %v2268_v8 = vld [vmem:[#allocation5 + $0x44] ss:$8 sps:$4 sm:$0xff]   ;;  %v2270_v9 = vld [vmem:[#allocation5 + $0x40] ss:$8 sps:$4 sm:$0xff]   ;;  %v2271_v10 = vld [vmem:[#allocation5 + $0x54] ss:$8 sps:$4 sm:$0xff]  }
  0x96   :  { %v2273_v11 = vld [vmem:[#allocation5 + $0x50] ss:$8 sps:$4 sm:$0xff]   ;;  %v2274_v12 = vld [vmem:[#allocation5 + $0x64] ss:$8 sps:$4 sm:$0xff]   ;;  %v2276_v15 = vld [vmem:[#allocation5 + $0x60] ss:$8 sps:$4 sm:$0xff]  }
  0x97   :  { %v160_v13 = vld [vmem:[#allocation2 + $0x8] sm:$0xff]  ;;  %v2280_v18 = vld [vmem:[#allocation5 + $0x84] ss:$8 sps:$4 sm:$0xff]   ;;  %v2282_v19 = vld [vmem:[#allocation5 + $0x80] ss:$8 sps:$4 sm:$0xff]   ;;  %v2806_v61 = vmov 0  }
  0x98   :  { %468 = vmatpush1.bf16.msra.mxu0 %v2261_v3  ;;  %v163_v14 = vpack.c.bf16 %v160_v13, %v160_v13  ;;  %v2277_v16 = vld [vmem:[#allocation5 + $0x74] ss:$8 sps:$4 sm:$0xff]   ;;  %v2279_v17 = vld [vmem:[#allocation5 + $0x70] ss:$8 sps:$4 sm:$0xff]   ;;  %v2328_v21 = vld [vmem:[#allocation7 + $0x4] ss:$8 sps:$4 sm:$0xff]  }
  0x99   :  { %469 = vmatprep.subr.bf16.mxu0 %v2262_v4  ;;  %v2283_v20 = vld [vmem:[#allocation5 + $0x94] ss:$8 sps:$4 sm:$0xff]   ;;  %v2330_v22 = vld [vmem:[#allocation7] ss:$8 sps:$4 sm:$0xff]   ;;  %v2285_v23 = vld [vmem:[#allocation5 + $0x90] ss:$8 sps:$4 sm:$0xff]   ;;  %753 = vmatprep.subr.bf16.mxu1 %v2328_v21 }
  0x9a   :  { %497 = vmatprep.mubr.bf16.mxu0 %v163_v14  ;;  %v2331_v24 = vld [vmem:[#allocation7 + $0x14] ss:$8 sps:$4 sm:$0xff]   ;;  %v2286_v25 = vld [vmem:[#allocation5 + $0xa4] ss:$8 sps:$4 sm:$0xff]   ;;  %754 = vmatpush1.bf16.msra.mxu1 %v2330_v22  ;;  %v2333_v26 = vld [vmem:[#allocation7 + $0x10] ss:$8 sps:$4 sm:$0xff]  }
  0x9b   :  { %755 = vmatprep.subr.bf16.mxu1 %v2331_v24  ;;  %v2334_v27 = vld [vmem:[#allocation7 + $0x24] ss:$8 sps:$4 sm:$0xff]   ;;  %v2288_v28 = vld [vmem:[#allocation5 + $0xa0] ss:$8 sps:$4 sm:$0xff]   ;;  %v2289_v29 = vld [vmem:[#allocation5 + $0xb4] ss:$8 sps:$4 sm:$0xff]   ;;  %v215_v24 = vlaneseq }
  0x9c   :  { %470 = vmatpush1.bf16.msra.mxu0 %v2264_v5  ;;  %v2336_v30 = vld [vmem:[#allocation7 + $0x20] ss:$8 sps:$4 sm:$0xff]   ;;  %v2337_v31 = vld [vmem:[#allocation7 + $0x34] ss:$8 sps:$4 sm:$0xff]   ;;  %v2291_v32 = vld [vmem:[#allocation5 + $0xb0] ss:$8 sps:$4 sm:$0xff]  }
  0x9d   :  { %471 = vmatprep.subr.bf16.mxu0 %v2265_v6  ;;  %v2292_v33 = vld [vmem:[#allocation5 + $0xc4] ss:$8 sps:$4 sm:$0xff]   ;;  %v2339_v34 = vld [vmem:[#allocation7 + $0x30] ss:$8 sps:$4 sm:$0xff]   ;;  %v2294_v36 = vld [vmem:[#allocation5 + $0xc0] ss:$8 sps:$4 sm:$0xff]  }
  0x9e   :  { %756 = vmatpush1.bf16.msra.mxu1 %v2333_v26  ;;  %v2340_v35 = vld [vmem:[#allocation7 + $0x44] ss:$8 sps:$4 sm:$0xff]   ;;  %v2295_v37 = vld [vmem:[#allocation5 + $0xd4] ss:$8 sps:$4 sm:$0xff]   ;;  %v2342_v38 = vld [vmem:[#allocation7 + $0x40] ss:$8 sps:$4 sm:$0xff]  }
  0x9f   :  { %757 = vmatprep.subr.bf16.mxu1 %v2334_v27  ;;  %v2343_v39 = vld [vmem:[#allocation7 + $0x54] ss:$8 sps:$4 sm:$0xff]   ;;  %v2297_v40 = vld [vmem:[#allocation5 + $0xd0] ss:$8 sps:$4 sm:$0xff]   ;;  %v2298_v41 = vld [vmem:[#allocation5 + $0xe4] ss:$8 sps:$4 sm:$0xff]  }
  0xa0   :  { %472 = vmatpush1.bf16.msra.mxu0 %v2267_v7  ;;  %v2345_v42 = vld [vmem:[#allocation7 + $0x50] ss:$8 sps:$4 sm:$0xff]   ;;  %v2346_v43 = vld [vmem:[#allocation7 + $0x64] ss:$8 sps:$4 sm:$0xff]   ;;  %v2300_v44 = vld [vmem:[#allocation5 + $0xe0] ss:$8 sps:$4 sm:$0xff]  }
  0xa1   :  { %473 = vmatprep.subr.bf16.mxu0 %v2268_v8  ;;  %v2301_v45 = vld [vmem:[#allocation5 + $0xf4] ss:$8 sps:$4 sm:$0xff]   ;;  %v2348_v46 = vld [vmem:[#allocation7 + $0x60] ss:$8 sps:$4 sm:$0xff]   ;;  %v2303_v48 = vld [vmem:[#allocation5 + $0xf0] ss:$8 sps:$4 sm:$0xff]  }
  0xa2   :  { %758 = vmatpush1.bf16.msra.mxu1 %v2336_v30  ;;  %v2349_v47 = vld [vmem:[#allocation7 + $0x74] ss:$8 sps:$4 sm:$0xff]   ;;  %v159_v49 = vld [vmem:[#allocation2] sm:$0xff]  ;;  %v2351_v51 = vld [vmem:[#allocation7 + $0x70] ss:$8 sps:$4 sm:$0xff]  }
  0xa3   :  { %759 = vmatprep.subr.bf16.mxu1 %v2337_v31  ;;  %v2306_v50 = vld [vmem:[#allocation5 + $0x104] ss:$8 sps:$4 sm:$0xff]   ;;  %v2304_v53 = vld [vmem:[#allocation5 + $0x100] ss:$8 sps:$4 sm:$0xff]   ;;  %v162_v54 = vpack.c.bf16 %v159_v49, %v159_v49  ;;  %v2309_v55 = vld [vmem:[#allocation5 + $0x114] ss:$8 sps:$4 sm:$0xff]  }
  0xa4   :  { %474 = vmatpush1.bf16.msra.mxu0 %v2270_v9  ;;  %v2352_v52 = vld [vmem:[#allocation7 + $0x84] ss:$8 sps:$4 sm:$0xff]   ;;  %v2354_v56 = vld [vmem:[#allocation7 + $0x80] ss:$8 sps:$4 sm:$0xff]   ;;  %v2355_v57 = vld [vmem:[#allocation7 + $0x94] ss:$8 sps:$4 sm:$0xff]  }
  0xa5   :  { %475 = vmatprep.subr.bf16.mxu0 %v2271_v10  ;;  %v2307_v58 = vld [vmem:[#allocation5 + $0x110] ss:$8 sps:$4 sm:$0xff]   ;;  %v2312_v59 = vld [vmem:[#allocation5 + $0x124] ss:$8 sps:$4 sm:$0xff]   ;;  %v2310_v63 = vld [vmem:[#allocation5 + $0x120] ss:$8 sps:$4 sm:$0xff]  }
  0xa6   :  { %760 = vmatpush1.bf16.msra.mxu1 %v2339_v34  ;;  %v2357_v60 = vld [vmem:[#allocation7 + $0x90] ss:$8 sps:$4 sm:$0xff]   ;;  %v2358_v62 = vld [vmem:[#allocation7 + $0xa4] ss:$8 sps:$4 sm:$0xff]   ;;  %v2315_v0 = vld [vmem:[#allocation5 + $0x134] ss:$8 sps:$4 sm:$0xff]  }
  0xa7   :  { %761 = vmatprep.subr.bf16.mxu1 %v2340_v35  ;;  %v2360_v1 = vld [vmem:[#allocation7 + $0xa0] ss:$8 sps:$4 sm:$0xff]   ;;  %v2361_v2 = vld [vmem:[#allocation7 + $0xb4] ss:$8 sps:$4 sm:$0xff]   ;;  %v2313_v3 = vld [vmem:[#allocation5 + $0x130] ss:$8 sps:$4 sm:$0xff]  }
  0xa8   :  { %476 = vmatpush1.bf16.msra.mxu0 %v2273_v11  ;;  %v2318_v4 = vld [vmem:[#allocation5 + $0x144] ss:$8 sps:$4 sm:$0xff]   ;;  %v2363_v5 = vld [vmem:[#allocation7 + $0xb0] ss:$8 sps:$4 sm:$0xff]   ;;  %v2316_v7 = vld [vmem:[#allocation5 + $0x140] ss:$8 sps:$4 sm:$0xff]  }
  0xa9   :  { %477 = vmatprep.subr.bf16.mxu0 %v2274_v12  ;;  %v2364_v6 = vld [vmem:[#allocation7 + $0xc4] ss:$8 sps:$4 sm:$0xff]   ;;  %v2321_v8 = vld [vmem:[#allocation5 + $0x154] ss:$8 sps:$4 sm:$0xff]   ;;  %v2366_v9 = vld [vmem:[#allocation7 + $0xc0] ss:$8 sps:$4 sm:$0xff]  }
  0xaa   :  { %762 = vmatpush1.bf16.msra.mxu1 %v2342_v38  ;;  %v2367_v10 = vld [vmem:[#allocation7 + $0xd4] ss:$8 sps:$4 sm:$0xff]   ;;  %v2319_v11 = vld [vmem:[#allocation5 + $0x150] ss:$8 sps:$4 sm:$0xff]   ;;  %v2324_v12 = vld [vmem:[#allocation5 + $0x164] ss:$8 sps:$4 sm:$0xff]  }
  0xab   :  { %763 = vmatprep.subr.bf16.mxu1 %v2343_v39  ;;  %v2369_v13 = vld [vmem:[#allocation7 + $0xd0] ss:$8 sps:$4 sm:$0xff]   ;;  %v2370_v14 = vld [vmem:[#allocation7 + $0xe4] ss:$8 sps:$4 sm:$0xff]   ;;  %v2373_v21 = vld [vmem:[#allocation7 + $0xf4] ss:$8 sps:$4 sm:$0xff]  }
  0xac   :  { %478 = vmatpush1.bf16.msra.mxu0 %v2276_v15  ;;  %v2322_v15 = vld [vmem:[#allocation5 + $0x160] ss:$8 sps:$4 sm:$0xff]   ;;  %v2375_v22 = vld [vmem:[#allocation7 + $0xf0] ss:$8 sps:$4 sm:$0xff]  }
  0xad   :  { %479 = vmatprep.subr.bf16.mxu0 %v2277_v16  ;;  %v2327_v16 = vld [vmem:[#allocation5 + $0x174] ss:$8 sps:$4 sm:$0xff]   ;;  %v213_v27 = vld [vmem:[%s3053_s2] sm:$0x3]  ;;  %v2391_v49 = vld [vmem:[#allocation8 + $0x50] ss:$8 sps:$4 sm:$0xff]  }
  0xae   :  { %764 = vmatpush1.bf16.msra.mxu1 %v2345_v42  ;;  %v2376_v38 = vld [vmem:[#allocation8] ss:$8 sps:$4 sm:$0xff]   ;;  %v2384_v42 = vld [vmem:[#allocation8 + $0x24] ss:$8 sps:$4 sm:$0xff]  }
  0xaf   :  { %765 = vmatprep.subr.bf16.mxu1 %v2346_v43  ;;  %v2382_v43 = vld [vmem:[#allocation8 + $0x20] ss:$8 sps:$4 sm:$0xff]  }
  0xb0   :  { %480 = vmatpush1.bf16.msra.mxu0 %v2279_v17  ;;  %v2325_v17 = vld [vmem:[#allocation5 + $0x170] ss:$8 sps:$4 sm:$0xff]  }
  0xb1   :  { %481 = vmatprep.subr.bf16.mxu0 %v2280_v18  ;;  %v161_v18 = vld [vmem:[#allocation2 + $0x10] sm:$0xff] }
  0xb2   :  { %766 = vmatpush1.bf16.msra.mxu1 %v2348_v46  ;;  %v2390_v46 = vld [vmem:[#allocation8 + $0x44] ss:$8 sps:$4 sm:$0xff]  }
  0xb3   :  { %767 = vmatprep.subr.bf16.mxu1 %v2349_v47  ;;  %v2388_v47 = vld [vmem:[#allocation8 + $0x40] ss:$8 sps:$4 sm:$0xff]  }
  0xb4   :  { %482 = vmatpush1.bf16.msra.mxu0 %v2282_v19  ;;  %v164_v19 = vpack.c.bf16 %v161_v18, %v161_v18  ;;  %v2444_v18 = vld [vmem:[#allocation10 + $0x64] ss:$8 sps:$4 sm:$0xff]  }
  0xb5   :  { %483 = vmatprep.subr.bf16.mxu0 %v2283_v20  ;;  %v2372_v20 = vld [vmem:[#allocation7 + $0xe0] ss:$8 sps:$4 sm:$0xff]  }
  0xb6   :  { %768 = vmatpush1.bf16.msra.mxu1 %v2351_v51  ;;  %v2394_v51 = vld [vmem:[#allocation8 + $0x60] ss:$8 sps:$4 sm:$0xff]  }
  0xb7   :  { %769 = vmatprep.subr.bf16.mxu1 %v2352_v52  ;;  %v2399_v52 = vld [vmem:[#allocation8 + $0x74] ss:$8 sps:$4 sm:$0xff]  }
  0xb8   :  { %484 = vmatpush1.bf16.msra.mxu0 %v2285_v23  ;;  %v2378_v23 = vld [vmem:[#allocation8 + $0x4] ss:$8 sps:$4 sm:$0xff]  }
  0xb9   :  { %485 = vmatprep.subr.bf16.mxu0 %v2286_v25  ;;  %v216_v25 = vshrl.u32 %v215_v24, 7  ;;  %v2453_v24 = vld [vmem:[#allocation10 + $0x94] ss:$8 sps:$4 sm:$0xff]  }
  0xba   :  { %770 = vmatpush1.bf16.msra.mxu1 %v2354_v56  ;;  %v2405_v56 = vld [vmem:[#allocation8 + $0x94] ss:$8 sps:$4 sm:$0xff]  }
  0xbb   :  { %771 = vmatprep.subr.bf16.mxu1 %v2355_v57  ;;  %v3002_v26 = vsub.s32 0, %v216_v25  ;;  %v2403_v57 = vld [vmem:[#allocation8 + $0x90] ss:$8 sps:$4 sm:$0xff]  }
  0xbc   :  { %486 = vmatpush1.bf16.msra.mxu0 %v2288_v28  ;;  %v3007_v28 = vsub.s32 1, %v216_v25  ;;  %v2451_v25 = vld [vmem:[#allocation10 + $0x90] ss:$8 sps:$4 sm:$0xff]  }
  0xbd   :  { %487 = vmatprep.subr.bf16.mxu0 %v2289_v29  ;;  %v218_v29 = vrot.slane %v213_v27, %v3002_v26 }
  0xbe   :  { %772 = vmatpush1.bf16.msra.mxu1 %v2357_v60  ;;  %v222_v30 = vrot.slane %v213_v27, %v3007_v28  ;;  %v2411_v60 = vld [vmem:[#allocation8 + $0xb4] ss:$8 sps:$4 sm:$0xff]   ;;  %v2456_v27 = vld [vmem:[#allocation10 + $0xa4] ss:$8 sps:$4 sm:$0xff]  }
  0xbf   :  { %773 = vmatprep.subr.bf16.mxu1 %v2358_v62  ;;  %v2414_v62 = vld [vmem:[#allocation8 + $0xc4] ss:$8 sps:$4 sm:$0xff]  }
  0xc0   :  { %488 = vmatpush1.bf16.msra.mxu0 %v2291_v32 }
  0xc1   :  { %489 = vmatprep.subr.bf16.mxu0 %v2292_v33 }
  0xc2   :  { %774 = vmatpush1.bf16.msra.mxu1 %v2360_v1  ;;  %v2415_v1 = vld [vmem:[#allocation8 + $0xd0] ss:$8 sps:$4 sm:$0xff]  }
  0xc3   :  { %775 = vmatprep.subr.bf16.mxu1 %v2361_v2  ;;  %v2420_v2 = vld [vmem:[#allocation8 + $0xe4] ss:$8 sps:$4 sm:$0xff]  }
  0xc4   :  { %490 = vmatpush1.bf16.msra.mxu0 %v2294_v36 }
  0xc5   :  { %491 = vmatprep.subr.bf16.mxu0 %v2295_v37 }
  0xc6   :  { %776 = vmatpush1.bf16.msra.mxu1 %v2363_v5  ;;  %v2421_v5 = vld [vmem:[#allocation8 + $0xf0] ss:$8 sps:$4 sm:$0xff]  }
  0xc7   :  { %777 = vmatprep.subr.bf16.mxu1 %v2364_v6  ;;  %v2424_v6 = vld [vmem:[#allocation10] ss:$8 sps:$4 sm:$0xff]  }
  0xc8   :  { %492 = vmatpush1.bf16.msra.mxu0 %v2297_v40  ;;  %v2381_v40 = vld [vmem:[#allocation8 + $0x14] ss:$8 sps:$4 sm:$0xff]  }
  0xc9   :  { %493 = vmatprep.subr.bf16.mxu0 %v2298_v41  ;;  %v2379_v41 = vld [vmem:[#allocation8 + $0x10] ss:$8 sps:$4 sm:$0xff]  }
  0xca   :  { %778 = vmatpush1.bf16.msra.mxu1 %v2366_v9  ;;  %v2427_v9 = vld [vmem:[#allocation10 + $0x10] ss:$8 sps:$4 sm:$0xff]  }
  0xcb   :  { %779 = vmatprep.subr.bf16.mxu1 %v2367_v10  ;;  %v2432_v10 = vld [vmem:[#allocation10 + $0x24] ss:$8 sps:$4 sm:$0xff]  }
  0xcc   :  { %494 = vmatpush1.bf16.msra.mxu0 %v2300_v44  ;;  %v2387_v44 = vld [vmem:[#allocation8 + $0x34] ss:$8 sps:$4 sm:$0xff]  }
  0xcd   :  { %495 = vmatprep.subr.bf16.mxu0 %v2301_v45  ;;  %v2385_v45 = vld [vmem:[#allocation8 + $0x30] ss:$8 sps:$4 sm:$0xff]  }
  0xce   :  { %780 = vmatpush1.bf16.msra.mxu1 %v2369_v13  ;;  %v2433_v13 = vld [vmem:[#allocation10 + $0x30] ss:$8 sps:$4 sm:$0xff]  }
  0xcf   :  { %781 = vmatprep.subr.bf16.mxu1 %v2370_v14  ;;  %v2438_v14 = vld [vmem:[#allocation10 + $0x44] ss:$8 sps:$4 sm:$0xff]  }
  0xd0   :  { %496 = vmatpush1.bf16.msra.mxu0 %v2303_v48  ;;  %v2393_v48 = vld [vmem:[#allocation8 + $0x54] ss:$8 sps:$4 sm:$0xff]  }
  0xd1   :  { %506 = vmatprep.subr.bf16.mxu0 %v2306_v50  ;;  %v2396_v50 = vld [vmem:[#allocation8 + $0x64] ss:$8 sps:$4 sm:$0xff]  }
  0xd2   :  { %782 = vmatpush1.bf16.msra.mxu1 %v2372_v20  ;;  %v2447_v20 = vld [vmem:[#allocation10 + $0x74] ss:$8 sps:$4 sm:$0xff]  }
  0xd3   :  { %498 = vmatmul.mubr.bf16.vlgmr.msra.gmra.mrb[0].mxu0 %v162_v54  ;;  %783 = vmatprep.subr.bf16.mxu1 %v2373_v21  ;;  %v2402_v54 = vld [vmem:[#allocation8 + $0x84] ss:$8 sps:$4 sm:$0xff]   ;;  %v2445_v21 = vld [vmem:[#allocation10 + $0x70] ss:$8 sps:$4 sm:$0xff]  }
  0xd4   :  { %507 = vmatpush1.bf16.msra.mxu0 %v2304_v53  ;;  %538 = vmatprep.mubr.bf16.mxu0 %v2806_v61  ;;  %v2397_v53 = vld [vmem:[#allocation8 + $0x70] ss:$8 sps:$4 sm:$0xff]  }
  0xd5   :  { %508 = vmatprep.subr.bf16.mxu0 %v2309_v55  ;;  %v2400_v55 = vld [vmem:[#allocation8 + $0x80] ss:$8 sps:$4 sm:$0xff]   ;;  %v2409_v61 = vld [vmem:[#allocation8 + $0xb0] ss:$8 sps:$4 sm:$0xff]  }
  0xd6   :  { %784 = vmatpush1.bf16.msra.mxu1 %v2375_v22  ;;  %v2450_v22 = vld [vmem:[#allocation10 + $0x84] ss:$8 sps:$4 sm:$0xff]  }
  0xd7   :  { %1002 = vmatprep.subr.bf16.mxu1 %v2378_v23  ;;  %v2448_v23 = vld [vmem:[#allocation10 + $0x80] ss:$8 sps:$4 sm:$0xff]  }
  0xd8   :  { %509 = vmatpush1.bf16.msra.mxu0 %v2307_v58  ;;  %v2408_v58 = vld [vmem:[#allocation8 + $0xa4] ss:$8 sps:$4 sm:$0xff]  }
  0xd9   :  { %510 = vmatprep.subr.bf16.mxu0 %v2312_v59  ;;  %v2406_v59 = vld [vmem:[#allocation8 + $0xa0] ss:$8 sps:$4 sm:$0xff]  }
  0xdc   :  { %511 = vmatpush1.bf16.msra.mxu0 %v2310_v63  ;;  %v2412_v63 = vld [vmem:[#allocation8 + $0xc0] ss:$8 sps:$4 sm:$0xff]  }
  0xdd   :  { %512 = vmatprep.subr.bf16.mxu0 %v2315_v0  ;;  %v2417_v0 = vld [vmem:[#allocation8 + $0xd4] ss:$8 sps:$4 sm:$0xff]  }
  0xe0   :  { %513 = vmatpush1.bf16.msra.mxu0 %v2313_v3  ;;  %v2418_v3 = vld [vmem:[#allocation8 + $0xe0] ss:$8 sps:$4 sm:$0xff]  }
  0xe1   :  { %514 = vmatprep.subr.bf16.mxu0 %v2318_v4  ;;  %v2423_v4 = vld [vmem:[#allocation8 + $0xf4] ss:$8 sps:$4 sm:$0xff]  }
  0xe4   :  { %515 = vmatpush1.bf16.msra.mxu0 %v2316_v7  ;;  %v2426_v7 = vld [vmem:[#allocation10 + $0x4] ss:$8 sps:$4 sm:$0xff]  }
  0xe5   :  { %516 = vmatprep.subr.bf16.mxu0 %v2321_v8  ;;  %v2429_v8 = vld [vmem:[#allocation10 + $0x14] ss:$8 sps:$4 sm:$0xff]  }
  0xe8   :  { %517 = vmatpush1.bf16.msra.mxu0 %v2319_v11  ;;  %v2430_v11 = vld [vmem:[#allocation10 + $0x20] ss:$8 sps:$4 sm:$0xff]  }
  0xe9   :  { %518 = vmatprep.subr.bf16.mxu0 %v2324_v12  ;;  %v2435_v12 = vld [vmem:[#allocation10 + $0x34] ss:$8 sps:$4 sm:$0xff]  }
  0xec   :  { %519 = vmatpush1.bf16.msra.mxu0 %v2322_v15  ;;  %v2436_v15 = vld [vmem:[#allocation10 + $0x40] ss:$8 sps:$4 sm:$0xff]  }
  0xed   :  { %520 = vmatprep.subr.bf16.mxu0 %v2327_v16  ;;  %v2441_v16 = vld [vmem:[#allocation10 + $0x54] ss:$8 sps:$4 sm:$0xff]  }
  0xf0   :  { %521 = vmatpush1.bf16.msra.mxu0 %v2325_v17  ;;  %v2439_v17 = vld [vmem:[#allocation10 + $0x50] ss:$8 sps:$4 sm:$0xff]  }
  0xf1   :  { %1251 = vmatprep.subr.bf16.mxu0 %v2426_v7  ;;  %v2501_v7 = vld [vmem:[#allocation11 + $0x94] ss:$8 sps:$4 sm:$0xff]  }
  0xf3   :  { %539 = vmatmul.mubr.bf16.vlgmr.msra.gmra.mrb[0].mxu0 %v164_v19  ;;  %v2442_v19 = vld [vmem:[#allocation10 + $0x60] ss:$8 sps:$4 sm:$0xff]  }
  0xf4   :  { %1252 = vmatpush1.bf16.msra.mxu0 %v2424_v6  ;;  %v2496_v6 = vld [vmem:[#allocation11 + $0x80] ss:$8 sps:$4 sm:$0xff]  }
  0xf5   :  { %1253 = vmatprep.subr.bf16.mxu0 %v2429_v8  ;;  %v2499_v8 = vld [vmem:[#allocation11 + $0x90] ss:$8 sps:$4 sm:$0xff]  }
  0xf8   :  { %1254 = vmatpush1.bf16.msra.mxu0 %v2427_v9  ;;  %v2504_v9 = vld [vmem:[#allocation11 + $0xa4] ss:$8 sps:$4 sm:$0xff]  }
  0xf9   :  { %1255 = vmatprep.subr.bf16.mxu0 %v2432_v10  ;;  %v2502_v10 = vld [vmem:[#allocation11 + $0xa0] ss:$8 sps:$4 sm:$0xff]  }
  0xfc   :  { %1256 = vmatpush1.bf16.msra.mxu0 %v2430_v11  ;;  %v2507_v11 = vld [vmem:[#allocation11 + $0xb4] ss:$8 sps:$4 sm:$0xff]  }
  0xfd   :  { %1257 = vmatprep.subr.bf16.mxu0 %v2435_v12  ;;  %v2505_v12 = vld [vmem:[#allocation11 + $0xb0] ss:$8 sps:$4 sm:$0xff]  }
 0x100   :  { %1258 = vmatpush1.bf16.msra.mxu0 %v2433_v13  ;;  %v2510_v13 = vld [vmem:[#allocation11 + $0xc4] ss:$8 sps:$4 sm:$0xff]  }
 0x101   :  { %1259 = vmatprep.subr.bf16.mxu0 %v2438_v14  ;;  %v2508_v14 = vld [vmem:[#allocation11 + $0xc0] ss:$8 sps:$4 sm:$0xff]  }
 0x104   :  { %1260 = vmatpush1.bf16.msra.mxu0 %v2436_v15  ;;  %v2513_v15 = vld [vmem:[#allocation11 + $0xd4] ss:$8 sps:$4 sm:$0xff]  }
 0x105   :  { %1261 = vmatprep.subr.bf16.mxu0 %v2441_v16  ;;  %v2511_v16 = vld [vmem:[#allocation11 + $0xd0] ss:$8 sps:$4 sm:$0xff]  }
 0x108   :  { %1262 = vmatpush1.bf16.msra.mxu0 %v2439_v17  ;;  %v830_v17 = vld [vmem:[%s3057_s6] sm:$0x3] }
 0x109   :  { %1263 = vmatprep.subr.bf16.mxu0 %v2444_v18  ;;  %v835_v18 = vrot.slane %v830_v17, %v3002_v26 }
 0x10c   :  { %1264 = vmatpush1.bf16.msra.mxu0 %v2442_v19  ;;  %v839_v19 = vrot.slane %v830_v17, %v3007_v28  ;;  %v2568_v17 = vld [vmem:[#allocation14 + $0x40] sm:$0xff]  }
 0x10d   :  { %1265 = vmatprep.subr.bf16.mxu0 %v2447_v20 }
 0x110   :  { %1266 = vmatpush1.bf16.msra.mxu0 %v2445_v21 }
 0x111   :  { %1267 = vmatprep.subr.bf16.mxu0 %v2450_v22 }
 0x114   :  { %1268 = vmatpush1.bf16.msra.mxu0 %v2448_v23 }
 0x115   :  { %1269 = vmatprep.subr.bf16.mxu0 %v2453_v24 }
 0x118   :  { %1270 = vmatpush1.bf16.msra.mxu0 %v2451_v25 }
 0x119   :  { %1271 = vmatprep.subr.bf16.mxu0 %v2456_v27 }
 0x1c6   :  { %v540_v31 = vpop.f32.mrb[0].mxu0 }
 0x1c7   :  { %v2236_v32 = vadd.f32 %v540_v31, %v218_v29  ;;  %v542_v33 = vpop.f32.mrb[1].mxu0  ;;  %v2454_v29 = vld [vmem:[#allocation10 + $0xa0] ss:$8 sps:$4 sm:$0xff]   ;;  %v2457_v31 = vld [vmem:[#allocation10 + $0xb0] ss:$8 sps:$4 sm:$0xff]  }
 0x1c8   :  { %v544_v34 = vpop.f32.mrb[2].mxu0  ;;  %v2237_v35 = vadd.f32 %v542_v33, %v222_v30  ;;  %v2459_v30 = vld [vmem:[#allocation10 + $0xb4] ss:$8 sps:$4 sm:$0xff]   ;;  %1272 = vmatpush1.bf16.msra.mxu0 %v2454_v29  ;;  %v2460_v33 = vld [vmem:[#allocation10 + $0xc0] ss:$8 sps:$4 sm:$0xff]  }
 0x1c9   :  { %v545_v36 = vpop.f32.mrb[3].mxu0  ;;  %v547_v39 = vpack.c.bf16 %v2236_v32, %v2236_v32  ;;  %1273 = vmatprep.subr.bf16.mxu0 %v2459_v30  ;;  %v2462_v32 = vld [vmem:[#allocation10 + $0xc4] ss:$8 sps:$4 sm:$0xff]   ;;  %v2465_v34 = vld [vmem:[#allocation10 + $0xd4] ss:$8 sps:$4 sm:$0xff]  }
 0x1ca   :  { %v548_v37 = vpack.c.bf16 %v2237_v35, %v2237_v35  ;;  %v2463_v35 = vld [vmem:[#allocation10 + $0xd0] ss:$8 sps:$4 sm:$0xff]   ;;  %v581_v36 = vld [vmem:[%s3055_s4] sm:$0x3] }
 0x1cc   :  { %785 = vmatprep.mubr.bf16.mxu1 %v548_v37  ;;  %1274 = vmatpush1.bf16.msra.mxu0 %v2457_v31  ;;  %v586_v37 = vrot.slane %v581_v36, %v3002_v26 }
 0x1cd   :  { %786 = vmatmul.mubr.bf16.vlgmr.msra.gmra.mrb[0].mxu1 %v547_v39  ;;  %1275 = vmatprep.subr.bf16.mxu0 %v2462_v32  ;;  %v2516_v32 = vld [vmem:[#allocation11 + $0xe4] ss:$8 sps:$4 sm:$0xff]  }
 0x1ce   :  { %1003 = vmatpush1.bf16.msra.mxu1 %v2376_v38  ;;  %v590_v38 = vrot.slane %v581_v36, %v3007_v28  ;;  %v2520_v36 = vld [vmem:[#allocation13] ss:$8 sps:$4 sm:$0xff]  }
 0x1cf   :  { %1004 = vmatprep.subr.bf16.mxu1 %v2381_v40 }
 0x1d0   :  { %1276 = vmatpush1.bf16.msra.mxu0 %v2460_v33  ;;  %v2514_v33 = vld [vmem:[#allocation11 + $0xe0] ss:$8 sps:$4 sm:$0xff]  }
 0x1d1   :  { %1277 = vmatprep.subr.bf16.mxu0 %v2465_v34  ;;  %v2519_v34 = vld [vmem:[#allocation11 + $0xf4] ss:$8 sps:$4 sm:$0xff]  }
 0x1d2   :  { %1005 = vmatpush1.bf16.msra.mxu1 %v2379_v41 }
 0x1d3   :  { %1006 = vmatprep.subr.bf16.mxu1 %v2384_v42 }
 0x1d4   :  { %1278 = vmatpush1.bf16.msra.mxu0 %v2463_v35  ;;  %v2517_v35 = vld [vmem:[#allocation11 + $0xf0] ss:$8 sps:$4 sm:$0xff]  }
 0x1d6   :  { %1007 = vmatpush1.bf16.msra.mxu1 %v2382_v43 }
 0x1d7   :  { %1008 = vmatprep.subr.bf16.mxu1 %v2387_v44 }
 0x1da   :  { %1009 = vmatpush1.bf16.msra.mxu1 %v2385_v45 }
 0x1db   :  { %1010 = vmatprep.subr.bf16.mxu1 %v2390_v46 }
 0x1de   :  { %1011 = vmatpush1.bf16.msra.mxu1 %v2388_v47 }
 0x1df   :  { %1012 = vmatprep.subr.bf16.mxu1 %v2393_v48 }
 0x1e2   :  { %1013 = vmatpush1.bf16.msra.mxu1 %v2391_v49  ;;  %v2468_v49 = vld [vmem:[#allocation10 + $0xe4] ss:$8 sps:$4 sm:$0xff]  }
 0x1e3   :  { %1014 = vmatprep.subr.bf16.mxu1 %v2396_v50  ;;  %v2466_v50 = vld [vmem:[#allocation10 + $0xe0] ss:$8 sps:$4 sm:$0xff]   ;;  %1279 = vmatprep.subr.bf16.mxu0 %v2468_v49 }
 0x1e4   :  { %1280 = vmatpush1.bf16.msra.mxu0 %v2466_v50  ;;  %v2538_v49 = vld [vmem:[#allocation13 + $0x60] ss:$8 sps:$4 sm:$0xff]   ;;  %v2543_v50 = vld [vmem:[#allocation13 + $0x74] ss:$8 sps:$4 sm:$0xff]  }
 0x1e6   :  { %1015 = vmatpush1.bf16.msra.mxu1 %v2394_v51  ;;  %v2471_v51 = vld [vmem:[#allocation10 + $0xf4] ss:$8 sps:$4 sm:$0xff]  }
 0x1e7   :  { %1016 = vmatprep.subr.bf16.mxu1 %v2399_v52  ;;  %v2469_v52 = vld [vmem:[#allocation10 + $0xf0] ss:$8 sps:$4 sm:$0xff]   ;;  %1281 = vmatprep.subr.bf16.mxu0 %v2471_v51 }
 0x1e8   :  { %1282 = vmatpush1.bf16.msra.mxu0 %v2469_v52  ;;  %v2541_v51 = vld [vmem:[#allocation13 + $0x70] ss:$8 sps:$4 sm:$0xff]   ;;  %v2546_v52 = vld [vmem:[#allocation13 + $0x84] ss:$8 sps:$4 sm:$0xff]  }
 0x1ea   :  { %1017 = vmatpush1.bf16.msra.mxu1 %v2397_v53  ;;  %v2472_v53 = vld [vmem:[#allocation11] ss:$8 sps:$4 sm:$0xff]  }
 0x1eb   :  { %1018 = vmatprep.subr.bf16.mxu1 %v2402_v54  ;;  %v2474_v54 = vld [vmem:[#allocation11 + $0x4] ss:$8 sps:$4 sm:$0xff]  }
 0x1ee   :  { %1019 = vmatpush1.bf16.msra.mxu1 %v2400_v55  ;;  %v2477_v55 = vld [vmem:[#allocation11 + $0x14] ss:$8 sps:$4 sm:$0xff]  }
 0x1ef   :  { %1020 = vmatprep.subr.bf16.mxu1 %v2405_v56  ;;  %v2475_v56 = vld [vmem:[#allocation11 + $0x10] ss:$8 sps:$4 sm:$0xff]  }
 0x1f2   :  { %1021 = vmatpush1.bf16.msra.mxu1 %v2403_v57  ;;  %v2480_v57 = vld [vmem:[#allocation11 + $0x24] ss:$8 sps:$4 sm:$0xff]  }
 0x1f3   :  { %1022 = vmatprep.subr.bf16.mxu1 %v2408_v58  ;;  %v2478_v58 = vld [vmem:[#allocation11 + $0x20] ss:$8 sps:$4 sm:$0xff]  }
 0x1f6   :  { %1023 = vmatpush1.bf16.msra.mxu1 %v2406_v59  ;;  %v2483_v59 = vld [vmem:[#allocation11 + $0x34] ss:$8 sps:$4 sm:$0xff]  }
 0x1f7   :  { %1024 = vmatprep.subr.bf16.mxu1 %v2411_v60  ;;  %v2481_v60 = vld [vmem:[#allocation11 + $0x30] ss:$8 sps:$4 sm:$0xff]  }
 0x1fa   :  { %1025 = vmatpush1.bf16.msra.mxu1 %v2409_v61  ;;  %v2486_v61 = vld [vmem:[#allocation11 + $0x44] ss:$8 sps:$4 sm:$0xff]  }
 0x1fb   :  { %1026 = vmatprep.subr.bf16.mxu1 %v2414_v62  ;;  %v2484_v62 = vld [vmem:[#allocation11 + $0x40] ss:$8 sps:$4 sm:$0xff]  }
 0x1fe   :  { %1027 = vmatpush1.bf16.msra.mxu1 %v2412_v63  ;;  %v2489_v63 = vld [vmem:[#allocation11 + $0x54] ss:$8 sps:$4 sm:$0xff]  }
 0x1ff   :  { %1028 = vmatprep.subr.bf16.mxu1 %v2417_v0  ;;  %v2487_v0 = vld [vmem:[#allocation11 + $0x50] ss:$8 sps:$4 sm:$0xff]  }
 0x202   :  { %1029 = vmatpush1.bf16.msra.mxu1 %v2415_v1  ;;  %v2492_v1 = vld [vmem:[#allocation11 + $0x64] ss:$8 sps:$4 sm:$0xff]  }
 0x203   :  { %1030 = vmatprep.subr.bf16.mxu1 %v2420_v2  ;;  %v2490_v2 = vld [vmem:[#allocation11 + $0x60] ss:$8 sps:$4 sm:$0xff]  }
 0x206   :  { %1031 = vmatpush1.bf16.msra.mxu1 %v2418_v3  ;;  %v2495_v3 = vld [vmem:[#allocation11 + $0x74] ss:$8 sps:$4 sm:$0xff]  }
 0x207   :  { %1032 = vmatprep.subr.bf16.mxu1 %v2423_v4  ;;  %v2493_v4 = vld [vmem:[#allocation11 + $0x70] ss:$8 sps:$4 sm:$0xff]  }
 0x20a   :  { %1033 = vmatpush1.bf16.msra.mxu1 %v2421_v5  ;;  %v2498_v5 = vld [vmem:[#allocation11 + $0x84] ss:$8 sps:$4 sm:$0xff]  }
 0x20b   :  { %1500 = vmatprep.subr.bf16.mxu1 %v2474_v54  ;;  %v2549_v54 = vld [vmem:[#allocation13 + $0x94] ss:$8 sps:$4 sm:$0xff]  }
 0x2a0   :  { %v787_v39 = vpop.f32.mrb[0].mxu1 }
 0x2a1   :  { %v788_v40 = vadd.f32 %v787_v39, %v586_v37  ;;  %v789_v41 = vpop.f32.mrb[1].mxu1  ;;  %v2522_v37 = vld [vmem:[#allocation13 + $0x4] ss:$8 sps:$4 sm:$0xff]   ;;  %v2523_v39 = vld [vmem:[#allocation13 + $0x10] ss:$8 sps:$4 sm:$0xff]  }
 0x2a2   :  { %v790_v42 = vadd.f32 %v789_v41, %v590_v38  ;;  %v791_v43 = vpop.f32.mrb[2].mxu1  ;;  %v2525_v38 = vld [vmem:[#allocation13 + $0x14] ss:$8 sps:$4 sm:$0xff]   ;;  %1749 = vmatprep.subr.bf16.mxu0 %v2522_v37  ;;  %v2526_v41 = vld [vmem:[#allocation13 + $0x20] ss:$8 sps:$4 sm:$0xff]  }
 0x2a3   :  { %v794_v44 = vmax.f32 %v788_v40, 0.0  ;;  %v792_v45 = vpop.f32.mrb[3].mxu1  ;;  %v2528_v40 = vld [vmem:[#allocation13 + $0x24] ss:$8 sps:$4 sm:$0xff]   ;;  %v2529_v43 = vld [vmem:[#allocation13 + $0x30] ss:$8 sps:$4 sm:$0xff]  }
 0x2a4   :  { %v795_v46 = vmax.f32 %v790_v42, 0.0  ;;  %v2531_v42 = vld [vmem:[#allocation13 + $0x34] ss:$8 sps:$4 sm:$0xff]   ;;  %v2532_v45 = vld [vmem:[#allocation13 + $0x40] ss:$8 sps:$4 sm:$0xff]  }
 0x2a5   :  { %v796_v48 = vpack.c.bf16 %v794_v44, %v794_v44  ;;  %v2534_v44 = vld [vmem:[#allocation13 + $0x44] ss:$8 sps:$4 sm:$0xff]  }
 0x2a6   :  { %v797_v47 = vpack.c.bf16 %v795_v46, %v795_v46  ;;  %v2537_v46 = vld [vmem:[#allocation13 + $0x54] ss:$8 sps:$4 sm:$0xff]  }
 0x2a8   :  { %1034 = vmatprep.mubr.bf16.mxu1 %v797_v47  ;;  %v2535_v47 = vld [vmem:[#allocation13 + $0x50] ss:$8 sps:$4 sm:$0xff]  }
 0x2a9   :  { %1035 = vmatmul.mubr.bf16.vlgmr.msra.gmra.mrb[4].mxu1 %v796_v48  ;;  %v2540_v48 = vld [vmem:[#allocation13 + $0x64] ss:$8 sps:$4 sm:$0xff]  }
 0x2aa   :  { %1501 = vmatpush1.bf16.msra.mxu1 %v2472_v53  ;;  %v2544_v53 = vld [vmem:[#allocation13 + $0x80] ss:$8 sps:$4 sm:$0xff]  }
 0x2ab   :  { %1502 = vmatprep.subr.bf16.mxu1 %v2477_v55  ;;  %v2547_v55 = vld [vmem:[#allocation13 + $0x90] ss:$8 sps:$4 sm:$0xff]  }
 0x2ae   :  { %1503 = vmatpush1.bf16.msra.mxu1 %v2475_v56  ;;  %v2552_v56 = vld [vmem:[#allocation13 + $0xa4] ss:$8 sps:$4 sm:$0xff]  }
 0x2af   :  { %1504 = vmatprep.subr.bf16.mxu1 %v2480_v57  ;;  %v2550_v57 = vld [vmem:[#allocation13 + $0xa0] ss:$8 sps:$4 sm:$0xff]  }
 0x2b2   :  { %1505 = vmatpush1.bf16.msra.mxu1 %v2478_v58  ;;  %v2555_v58 = vld [vmem:[#allocation13 + $0xb4] ss:$8 sps:$4 sm:$0xff]  }
 0x2b3   :  { %1506 = vmatprep.subr.bf16.mxu1 %v2483_v59  ;;  %v2553_v59 = vld [vmem:[#allocation13 + $0xb0] ss:$8 sps:$4 sm:$0xff]  }
 0x2b6   :  { %1507 = vmatpush1.bf16.msra.mxu1 %v2481_v60  ;;  %v2558_v60 = vld [vmem:[#allocation13 + $0xc4] ss:$8 sps:$4 sm:$0xff]  }
 0x2b7   :  { %1508 = vmatprep.subr.bf16.mxu1 %v2486_v61  ;;  %v2556_v61 = vld [vmem:[#allocation13 + $0xc0] ss:$8 sps:$4 sm:$0xff]  }
 0x2ba   :  { %1509 = vmatpush1.bf16.msra.mxu1 %v2484_v62  ;;  %v2561_v62 = vld [vmem:[#allocation13 + $0xd4] ss:$8 sps:$4 sm:$0xff]  }
 0x2bb   :  { %1510 = vmatprep.subr.bf16.mxu1 %v2489_v63  ;;  %v2559_v63 = vld [vmem:[#allocation13 + $0xd0] ss:$8 sps:$4 sm:$0xff]  }
 0x2be   :  { %1511 = vmatpush1.bf16.msra.mxu1 %v2487_v0  ;;  %v1079_v0 = vld [vmem:[%s3059_s8] sm:$0x3] }
 0x2bf   :  { %1512 = vmatprep.subr.bf16.mxu1 %v2492_v1  ;;  %v1084_v1 = vrot.slane %v1079_v0, %v3002_v26 }
 0x2c2   :  { %1513 = vmatpush1.bf16.msra.mxu1 %v2490_v2  ;;  %v1088_v2 = vrot.slane %v1079_v0, %v3007_v28 }
 0x2c3   :  { %1514 = vmatprep.subr.bf16.mxu1 %v2495_v3 }
 0x2c6   :  { %1515 = vmatpush1.bf16.msra.mxu1 %v2493_v4 }
 0x2c7   :  { %1516 = vmatprep.subr.bf16.mxu1 %v2498_v5 }
 0x2ca   :  { %1517 = vmatpush1.bf16.msra.mxu1 %v2496_v6 }
 0x2cb   :  { %1518 = vmatprep.subr.bf16.mxu1 %v2501_v7 }
 0x2ce   :  { %1519 = vmatpush1.bf16.msra.mxu1 %v2499_v8 }
 0x2cf   :  { %1520 = vmatprep.subr.bf16.mxu1 %v2504_v9 }
 0x2d2   :  { %1521 = vmatpush1.bf16.msra.mxu1 %v2502_v10 }
 0x2d3   :  { %1522 = vmatprep.subr.bf16.mxu1 %v2507_v11 }
 0x2d6   :  { %1523 = vmatpush1.bf16.msra.mxu1 %v2505_v12 }
 0x2d7   :  { %1524 = vmatprep.subr.bf16.mxu1 %v2510_v13  ;;  %v2564_v13 = vld [vmem:[#allocation13 + $0xe4] ss:$8 sps:$4 sm:$0xff]  }
 0x2da   :  { %1525 = vmatpush1.bf16.msra.mxu1 %v2508_v14  ;;  %v2562_v14 = vld [vmem:[#allocation13 + $0xe0] ss:$8 sps:$4 sm:$0xff]  }
 0x2db   :  { %1526 = vmatprep.subr.bf16.mxu1 %v2513_v15  ;;  %v2567_v15 = vld [vmem:[#allocation13 + $0xf4] ss:$8 sps:$4 sm:$0xff]  }
 0x2de   :  { %1527 = vmatpush1.bf16.msra.mxu1 %v2511_v16  ;;  %v2565_v16 = vld [vmem:[#allocation13 + $0xf0] ss:$8 sps:$4 sm:$0xff]  }
 0x2df   :  { %1528 = vmatprep.subr.bf16.mxu1 %v2516_v32 }
 0x2e2   :  { %1529 = vmatpush1.bf16.msra.mxu1 %v2514_v33 }
 0x2e3   :  { %1530 = vmatprep.subr.bf16.mxu1 %v2519_v34 }
 0x2e6   :  { %1531 = vmatpush1.bf16.msra.mxu1 %v2517_v35 }
 0x2e7   :  { %2214 = vmatprep.subr.bf16.mxu1 %v2568_v17 }
 0x37c   :  { %v1036_v20 = vpop.f32.mrb[4].mxu1 }
 0x37d   :  { %v1037_v21 = vadd.f32 %v1036_v20, %v835_v18  ;;  %v1038_v22 = vpop.f32.mrb[5].mxu1  ;;  %v2569_v18 = vld [vmem:[#allocation14] sm:$0xff]   ;;  %v2571_v20 = vld [vmem:[#allocation14 + $0x8] sm:$0xff]  }
 0x37e   :  { %v1039_v23 = vadd.f32 %v1038_v22, %v839_v19  ;;  %v1040_v24 = vpop.f32.mrb[6].mxu1  ;;  %v2570_v19 = vld [vmem:[#allocation14 + $0x48] sm:$0xff]   ;;  %v2573_v22 = vld [vmem:[#allocation14 + $0x10] sm:$0xff]  }
 0x37f   :  { %v1043_v25 = vmax.f32 %v1037_v21, 0.0  ;;  %v1041_v27 = vpop.f32.mrb[7].mxu1  ;;  %v2572_v21 = vld [vmem:[#allocation14 + $0x50] sm:$0xff]   ;;  %v2575_v24 = vld [vmem:[#allocation14 + $0x18] sm:$0xff]  }
 0x380   :  { %v1044_v29 = vmax.f32 %v1039_v23, 0.0  ;;  %v2574_v23 = vld [vmem:[#allocation14 + $0x58] sm:$0xff]   ;;  %v2577_v27 = vld [vmem:[#allocation14 + $0x20] sm:$0xff]  }
 0x381   :  { %v1045_v31 = vpack.c.bf16 %v1043_v25, %v1043_v25  ;;  %v2576_v25 = vld [vmem:[#allocation14 + $0x60] sm:$0xff]  }
 0x382   :  { %v1046_v30 = vpack.c.bf16 %v1044_v29, %v1044_v29  ;;  %v2578_v29 = vld [vmem:[#allocation14 + $0x68] sm:$0xff]  }
 0x384   :  { %1283 = vmatprep.mubr.bf16.mxu0 %v1046_v30  ;;  %v2579_v30 = vld [vmem:[#allocation14 + $0x28] sm:$0xff]  }
 0x385   :  { %1284 = vmatmul.mubr.bf16.vlgmr.msra.gmra.mrb[4].mxu0 %v1045_v31  ;;  %v1328_v31 = vld [vmem:[%s3061_s10] sm:$0x3] }
 0x386   :  { %1750 = vmatpush1.bf16.msra.mxu0 %v2520_v36  ;;  %v1333_v32 = vrot.slane %v1328_v31, %v3002_v26  ;;  %v1337_v33 = vrot.slane %v1328_v31, %v3007_v28 }
 0x387   :  { %1751 = vmatprep.subr.bf16.mxu0 %v2525_v38 }
 0x38a   :  { %1752 = vmatpush1.bf16.msra.mxu0 %v2523_v39 }
 0x38b   :  { %1753 = vmatprep.subr.bf16.mxu0 %v2528_v40 }
 0x38e   :  { %1754 = vmatpush1.bf16.msra.mxu0 %v2526_v41 }
 0x38f   :  { %1755 = vmatprep.subr.bf16.mxu0 %v2531_v42 }
 0x392   :  { %1756 = vmatpush1.bf16.msra.mxu0 %v2529_v43 }
 0x393   :  { %1757 = vmatprep.subr.bf16.mxu0 %v2534_v44  ;;  %v2580_v44 = vld [vmem:[#allocation14 + $0x70] sm:$0xff]  }
 0x396   :  { %1758 = vmatpush1.bf16.msra.mxu0 %v2532_v45  ;;  %v2581_v45 = vld [vmem:[#allocation14 + $0x30] sm:$0xff]  }
 0x397   :  { %1759 = vmatprep.subr.bf16.mxu0 %v2537_v46  ;;  %v2582_v46 = vld [vmem:[#allocation14 + $0x78] sm:$0xff]  }
 0x39a   :  { %1760 = vmatpush1.bf16.msra.mxu0 %v2535_v47  ;;  %v2583_v47 = vld [vmem:[#allocation14 + $0x38] sm:$0xff]  }
 0x39b   :  { %1761 = vmatprep.subr.bf16.mxu0 %v2540_v48  ;;  %v1577_v48 = vld [vmem:[%s3063_s12] sm:$0x3]  ;;  %s2807_s12 = smov [#allocation16]  }
 0x39c   :  { %s1976_s20 = sshll.u32 %s2807_s12, 4  ;;  %s1977_s20 = int_to_ptr.vmem [resolvable:$true] %s1976_s20 }
 0x39d   :  { %s2760_s21 = scalar_lea.vmem %s1977_s20, 128  ;;  %p2765_p9 = scmp.lt.s32.totalorder %s1977_s20, %s1977_s20 }
 0x39e   :  { %1762 = vmatpush1.bf16.msra.mxu0 %v2538_v49  ;;  %v1582_v49 = vrot.slane %v1577_v48, %v3002_v26  ;;  %p2761_p8 = scmp.ne.s32.totalorder %s1977_s20, %s2760_s21  ;;  %p2766_p10 = scmp.lt.s32.totalorder %s2760_s21, %s2760_s21 }
 0x39f   :  { %1763 = vmatprep.subr.bf16.mxu0 %v2543_v50  ;;  %v1586_v50 = vrot.slane %v1577_v48, %v3007_v28 }
 0x3a0   :  { %p2767_p11 = por %p2766_p10, %p2765_p9 }
 0x3a2   :  { %1764 = vmatpush1.bf16.msra.mxu0 %v2541_v51  ;;  %p2768_p12 = pnand %p2767_p11, %p2761_p8 }
 0x3a3   :  { %1765 = vmatprep.subr.bf16.mxu0 %v2546_v52 }
 0x3a6   :  { %1766 = vmatpush1.bf16.msra.mxu0 %v2544_v53 }
 0x3a7   :  { %1767 = vmatprep.subr.bf16.mxu0 %v2549_v54 }
 0x3aa   :  { %1768 = vmatpush1.bf16.msra.mxu0 %v2547_v55 }
 0x3ab   :  { %1769 = vmatprep.subr.bf16.mxu0 %v2552_v56 }
 0x3ae   :  { %1770 = vmatpush1.bf16.msra.mxu0 %v2550_v57 }
 0x3af   :  { %1771 = vmatprep.subr.bf16.mxu0 %v2555_v58 }
 0x3b2   :  { %1772 = vmatpush1.bf16.msra.mxu0 %v2553_v59 }
 0x3b3   :  { %1773 = vmatprep.subr.bf16.mxu0 %v2558_v60 }
 0x3b6   :  { %1774 = vmatpush1.bf16.msra.mxu0 %v2556_v61 }
 0x3b7   :  { %1775 = vmatprep.subr.bf16.mxu0 %v2561_v62  ;;  %v2197_v62 = vld [vmem:[%s3065_s14] ss:$0 sm:$0xff] }
 0x3ba   :  { %1776 = vmatpush1.bf16.msra.mxu0 %v2559_v63 }
 0x3bb   :  { %1777 = vmatprep.subr.bf16.mxu0 %v2564_v13 }
 0x3be   :  { %1778 = vmatpush1.bf16.msra.mxu0 %v2562_v14 }
 0x3bf   :  { %1779 = vmatprep.subr.bf16.mxu0 %v2567_v15 }
 0x3c2   :  { %1780 = vmatpush1.bf16.msra.mxu0 %v2565_v16 }
 0x458   :  { %v1285_v3 = vpop.f32.mrb[4].mxu0 }
 0x459   :  { %v1286_v4 = vadd.f32 %v1285_v3, %v1084_v1  ;;  %v1287_v5 = vpop.f32.mrb[5].mxu0 }
 0x45a   :  { %v1288_v6 = vadd.f32 %v1287_v5, %v1088_v2  ;;  %v1289_v7 = vpop.f32.mrb[6].mxu0 }
 0x45b   :  { %v1292_v8 = vmax.f32 %v1286_v4, 0.0  ;;  %v1290_v9 = vpop.f32.mrb[7].mxu0 }
 0x45c   :  { %v1293_v10 = vmax.f32 %v1288_v6, 0.0 }
 0x45d   :  { %v1294_v12 = vpack.c.bf16 %v1292_v8, %v1292_v8 }
 0x45e   :  { %v1295_v11 = vpack.c.bf16 %v1293_v10, %v1293_v10 }
 0x460   :  { %1532 = vmatprep.mubr.bf16.mxu1 %v1295_v11 }
 0x461   :  { %1533 = vmatmul.mubr.bf16.vlgmr.msra.gmra.mrb[8].mxu1 %v1294_v12 }
 0x462   :  { %2215 = vmatpush3.bf16.msra.mxu1 %v2569_v18 }
 0x463   :  { %2216 = vmatprep.subr.bf16.mxu1 %v2570_v19 }
 0x466   :  { %2217 = vmatpush3.bf16.msra.mxu1 %v2571_v20 }
 0x467   :  { %2218 = vmatprep.subr.bf16.mxu1 %v2572_v21 }
 0x46a   :  { %2219 = vmatpush3.bf16.msra.mxu1 %v2573_v22 }
 0x46b   :  { %2220 = vmatprep.subr.bf16.mxu1 %v2574_v23 }
 0x46e   :  { %2221 = vmatpush3.bf16.msra.mxu1 %v2575_v24 }
 0x46f   :  { %2222 = vmatprep.subr.bf16.mxu1 %v2576_v25 }
 0x472   :  { %2223 = vmatpush3.bf16.msra.mxu1 %v2577_v27 }
 0x473   :  { %2224 = vmatprep.subr.bf16.mxu1 %v2578_v29 }
 0x476   :  { %2225 = vmatpush3.bf16.msra.mxu1 %v2579_v30 }
 0x477   :  { %2226 = vmatprep.subr.bf16.mxu1 %v2580_v44 }
 0x47a   :  { %2227 = vmatpush3.bf16.msra.mxu1 %v2581_v45 }
 0x47b   :  { %2228 = vmatprep.subr.bf16.mxu1 %v2582_v46 }
 0x47e   :  { %2229 = vmatpush3.bf16.msra.mxu1 %v2583_v47 }
 0x534   :  { %v1534_v34 = vpop.f32.mrb[8].mxu1 }
 0x535   :  { %v1535_v35 = vadd.f32 %v1534_v34, %v1333_v32  ;;  %v1536_v36 = vpop.f32.mrb[9].mxu1 }
 0x536   :  { %v1537_v37 = vadd.f32 %v1536_v36, %v1337_v33  ;;  %v1538_v38 = vpop.f32.mrb[10].mxu1 }
 0x537   :  { %v1541_v39 = vmax.f32 %v1535_v35, 0.0  ;;  %v1539_v40 = vpop.f32.mrb[11].mxu1 }
 0x538   :  { %v1542_v41 = vmax.f32 %v1537_v37, 0.0 }
 0x539   :  { %v1543_v43 = vpack.c.bf16 %v1541_v39, %v1541_v39 }
 0x53a   :  { %v1544_v42 = vpack.c.bf16 %v1542_v41, %v1542_v41 }
 0x53c   :  { %1781 = vmatprep.mubr.bf16.mxu0 %v1544_v42 }
 0x53d   :  { %1782 = vmatmul.mubr.bf16.vlgmr.msra.gmra.mrb[8].mxu0 %v1543_v43 }
 0x610   :  { %v1783_v51 = vpop.f32.mrb[8].mxu0 }
 0x611   :  { %v1784_v52 = vadd.f32 %v1783_v51, %v1582_v49  ;;  %v1785_v53 = vpop.f32.mrb[9].mxu0 }
 0x612   :  { %v1786_v54 = vadd.f32 %v1785_v53, %v1586_v50  ;;  %v1787_v55 = vpop.f32.mrb[10].mxu0 }
 0x613   :  { %v1790_v56 = vmax.f32 %v1784_v52, 0.0  ;;  %v1788_v57 = vpop.f32.mrb[11].mxu0 }
 0x614   :  { %v1791_v58 = vmax.f32 %v1786_v54, 0.0 }
 0x615   :  { %v1792_v60 = vpack.c.bf16 %v1790_v56, %v1790_v56 }
 0x616   :  { %v1793_v59 = vpack.c.bf16 %v1791_v58, %v1791_v58 }
 0x618   :  { %1961 = vmatprep.mubr.bf16.mxu1 %v1793_v59 }
 0x619   :  { %1962 = vmatmul.mubr.bf16.vlgmr.msra.gmra.mrb[12].mxu1 %v1792_v60 }
 0x6ec   :  { %v2230_v61 = vpop.f32.mrb[12].mxu1 }
 0x6ed   :  { %v2231_v26 = vpop.f32.mrb[13].mxu1 }
 0x6ee   :  { %v2232_v28 = vadd.f32 %v2231_v26, %v2230_v61  ;;  %v2233_v63 = vpop.f32.mrb[14].mxu1 }
 0x6ef   :  { %v2234_v0 = vpop.f32.mrb[15].mxu1 }
 0x6f0   :  { %v1964_v1 = vadd.f32 %v2232_v28, %v2197_v62 }
 0x6f2   :  { %1969 = vst [vmem:[#allocation16] sm:$0xff] %v1964_v1 }
 0x6f3   :  { %2771 = shalt.err (!%p2768_p12)
}
 0x6f4   :  { %s3069_s5 = sld [smem:[#allocation23_spill]] }
 0x6fa   :  { %s2772_s14 = scalar_lea.hbm %s3069_s5, 128 }
 0x6fb   :  { %p2773_p13 = scmp.ne.s32.totalorder %s3069_s5, %s2772_s14  ;;  %p2776_p0 = scmp.lt.u32.totalorder %s2772_s14, %s3069_s5 }
 0x6fd   :  { %p2778_p1 = pnand %p2776_p0, %p2773_p13 }
 0x6ff   :  { %2781 = shalt.err (!%p2778_p1)
}
 0x700   :  { %1979 = dma.vmem_to_hbm [thread:$0]  %s1977_s20, 128, %s3069_s5, [#allocation4]  }
 0x701   :  { %2792 = dma.done.wait [#allocation4], 128  }
 0x702   :  { %2793 = vsyncadd [#allocation4], 4294967168 }
 0x703   :  { %1983 = vsyncpa [#allocation3], 1 }
 0x704   :  { %1984 = vsyncpa [#allocation6], 1 }
 0x705   :  { %1985 = vsyncpa [#allocation9], 1 }
 0x706   :  { %1986 = vsyncpa [#allocation12], 1 }
 0x707   :  { %1987 = vsyncpa [#allocation15], 1 }
 0x708   :  { %1988 = vsyncpa [#allocation4], 1 }

</bundles_post_ra>
